<compile_context>
chip_gen: v7x
topology: tpu7x:2x2x1
jax: 0.10.0
libtpu: 0.0.40
codegen_flags: <defaults>
</compile_context>

<pallas_src>
import math
import jax
import jax.numpy as jnp
from jax.experimental import pallas as pl
from jax.experimental.pallas import tpu as pltpu


# packed (11, H) f32 parameter-row table
_R = 0                                   # rows 0..2 : r_k = w_de^T @ (W_pd^T)^k
_C = 3                                   # rows 3..5 : c_k (dynamic cumulative bias)
_B_PQ, _W_ATTN, _B_FC1, _W_FC3, _B_FC3 = 6, 7, 8, 9, 10


# ----------------------------------------------------------------------------- kernel
def state_critic_kernel(x_ref, w_ref, w_hh_ref, rows_ref, out_ref):
    f32 = jnp.float32
    Bt = out_ref.shape[2]
    N = x_ref.shape[0]
    S = N // Bt
    H = rows_ref.shape[1]
    C = x_ref.shape[1]                    # static_size + 2   ([x_s | x_d | 1])

    x = x_ref[...]                        # (N, C)   f32
    rows = rows_ref[...]                  # (11, H)  f32
    w_pq_t = w_hh_ref[0]                  # (H, H)   f32
    w_fc1_t = w_hh_ref[1]                 # (H, H)   f32

    b_pq = rows[_B_PQ:_B_PQ + 1]          # (1, H)
    w_attn = rows[_W_ATTN:_W_ATTN + 1]    # (1, H)

    # dynamic-channel column, kept only for the rank-1 last_hh correction
    x_d = x[:, C - 2:C - 1].reshape(Bt, S, 1)                          # (Bt, S, 1)

    # project_query(zeros) == b_pq exactly — skip the first matmul.
    q = jnp.broadcast_to(b_pq, (Bt, H))
    last_hh = None

    # 3 refinement steps, unrolled (iterations are not structurally uniform).
    for k in range(3):
        if k > 0:
            q = jnp.dot(last_hh, w_pq_t, preferred_element_type=f32) + b_pq

        # static + dynamic + bias in ONE small-K f32 dot (bias rides the ones column):
        #   h_pre = sh_k + dh_k
        h_pre = jnp.dot(x, w_ref[k], preferred_element_type=f32).reshape(Bt, S, H)

        hidden = h_pre + q[:, None, :]
        logits = jnp.sum(jnp.tanh(hidden) * w_attn, axis=-1)           # (Bt, S)
        logits = logits - jnp.max(logits, axis=-1, keepdims=True)
        p_un = jnp.exp(logits)
        attns = p_un / jnp.sum(p_un, axis=-1, keepdims=True)           # exact divide
        a3 = attns[:, :, None]                                         # (Bt, S, 1)

        if S >= 128:
            # big-S path: do the weighted sum on the otherwise-idle MXU
            hsum = jnp.einsum("bqs,bsh->bqh", attns[:, None, :], h_pre,
                              preferred_element_type=f32)[:, 0, :]
        else:
            hsum = jnp.sum(h_pre * a3, axis=1)                         # (Bt, H)

        # last_hh uses the *static* hidden only; undo the rank-1 dynamic part:
        #   sum_s a*sh = sum_s a*(sh+dh) - (sum_s a*x_d)*r_k - c_k   (sum_s a == 1)
        alpha = jnp.sum(x_d * a3, axis=1)                              # (Bt, 1)
        last_hh = hsum - alpha * rows[_R + k:_R + k + 1] - rows[_C + k:_C + k + 1]

    fc1 = jnp.dot(last_hh, w_fc1_t, preferred_element_type=f32) + rows[_B_FC1:_B_FC1 + 1]
    fc1 = jnp.maximum(fc1, 0.0)

    # lane-dense result row: batch on the lane axis, one vector store per tile.
    out_row = jnp.dot(rows[_W_FC3:_W_FC3 + 1], fc1.T, preferred_element_type=f32)  # (1, Bt)
    out_row = out_row + rows[_B_FC3:_B_FC3 + 1, 0:1]
    out_ref[...] = out_row.reshape(1, 1, Bt)


# ----------------------------------------------------------------------------- param packing (done once)
def pack_params(p):
    """Fuse / transpose / pack PyTorch-layout params into kernel-ready f32 arrays."""
    f32 = jnp.float32
    H = p["w_pq"].shape[0]

    E = p["w_se"].T.astype(f32)               # (Cs, H)
    A = p["w_e"].T.astype(f32)                # (H, H)
    b_e = p["b_e"][None].astype(f32)
    P = p["w_pd"].T.astype(f32)
    b_pd = p["b_pd"][None].astype(f32)

    Ws, rs, cs = [], [], []
    M, bcum = E, p["b_se"][None].astype(f32)
    r, c = p["w_de"].T.astype(f32), p["b_de"][None].astype(f32)
    for _ in range(3):
        M = M @ A                              # static weights:  W_se^T (W_e^T)^k
        bcum = bcum @ A + b_e                  # static cumulative bias
        r = r @ P                              # dynamic rank-1 row
        c = c @ P + b_pd                       # dynamic cumulative bias
        # fused per-step projection for LHS [x_s | x_d | 1]
        Ws.append(jnp.concatenate([M, r, bcum + c], axis=0))          # (Cs+2, H)
        rs.append(r)
        cs.append(c)

    w_proj = jnp.stack(Ws).astype(f32)                                 # (3, Cs+2, H)
    rows = jnp.concatenate(
        rs + cs + [p["b_pq"][None], p["w_attn"], p["b_fc1"][None], p["w_fc3"],
                   jnp.full((1, H), p["b_fc3"][0], f32)],
        axis=0).astype(f32)                                            # (11, H)
    w_hh = jnp.stack([p["w_pq"].T, p["w_fc1"].T]).astype(f32)          # (2, H, H)
    return {"w_proj": w_proj, "rows": rows, "w_hh": w_hh}


# ----------------------------------------------------------------------------- wrapper
def state_critic_forward(static, dynamic, packed, *, block_batch=None):
    """static: (B, static_size, S), dynamic: (B, C_dyn>=2, S) — PyTorch NCS layout."""
    B, Cs, S = static.shape
    C = packed["w_proj"].shape[1]
    assert C == Cs + 2

    # TODO(synk): for S not a multiple of 8, pad the sequence and mask padded logits
    # with -inf before the softmax; test shapes keep S % 8 == 0.
    assert S % 8 == 0, "S must be a multiple of 8 (pad + mask softmax otherwise)"

    if block_batch is None:
        cands = [d for d in range(1, B + 1) if B % d == 0 and ((d * S) % 8 == 0 or d == B)]
        # vreg-aware cap on rows per tile AND >=2 grid steps so v7x's 2nd TC gets work
        pref = [d for d in cands if d * S <= 256 and B // d >= 2]
        pref = pref or [d for d in cands if B // d >= 2] or cands
        block_batch = max(pref)
    Bt = block_batch
    assert B % Bt == 0 and ((Bt * S) % 8 == 0 or Bt == B), (B, Bt, S)
    G = B // Bt

    # Single fused wrapper op: the NCS->NSC swap is folded into the concat that the
    # x_d/bias folding needs anyway; no bf16 cast pass, one activation stream.
    x = jnp.concatenate(
        [jnp.swapaxes(static, 1, 2),                     # (B, S, Cs)
         jnp.swapaxes(dynamic[:, 1:2, :], 1, 2),         # (B, S, 1)  == dynamic[:, 1:2, :]
         jnp.ones((B, S, 1), jnp.float32)],              # bias column
        axis=-1).astype(jnp.float32).reshape(B * S, C)

    def resident(shape):
        return pl.BlockSpec(shape, lambda i, _n=len(shape): (0,) * _n)

    out = pl.pallas_call(
        state_critic_kernel,
        out_shape=jax.ShapeDtypeStruct((G, 1, Bt), jnp.float32),
        grid=(G,),
        in_specs=[
            pl.BlockSpec((Bt * S, C), lambda i: (i, 0)),   # streamed per batch tile
            resident(packed["w_proj"].shape),              # weights stay resident
            resident(packed["w_hh"].shape),
            resident(packed["rows"].shape),
        ],
        out_specs=pl.BlockSpec((1, 1, Bt), lambda i: (i, 0, 0)),
        compiler_params=pltpu.CompilerParams(dimension_semantics=("parallel",)),
    )(x, packed["w_proj"], packed["w_hh"], packed["rows"])
    return out.reshape(B)                                  # torch.squeeze(..., 1) -> (B,)


# ----------------------------------------------------------------------------- params (PyTorch-equivalent init)
def init_params(key, static_size, dynamic_size, hidden_size):
    H = hidden_size
    ks = jax.random.split(key, 16)

    def xavier(k, fan_out, fan_in):
        bound = math.sqrt(6.0 / (fan_in + fan_out))
        return jax.random.uniform(k, (fan_out, fan_in), jnp.float32, -bound, bound)

    def bias(k, fan_in, n):
        bound = 1.0 / math.sqrt(fan_in)
        return jax.random.uniform(k, (n,), jnp.float32, -bound, bound)

    p = {}
    p["w_se"], p["b_se"] = xavier(ks[0], H, static_size), bias(ks[1], static_size, H)
    p["w_de"], p["b_de"] = xavier(ks[2], H, dynamic_size), bias(ks[3], dynamic_size, H)
    p["w_pq"], p["b_pq"] = xavier(ks[4], H, H), bias(ks[5], H, H)
    p["w_e"],  p["b_e"]  = xavier(ks[6], H, H), bias(ks[7], H, H)
    p["w_pd"], p["b_pd"] = xavier(ks[8], H, H), bias(ks[9], H, H)
    p["w_fc1"], p["b_fc1"] = xavier(ks[10], H, H), bias(ks[11], H, H)
    p["w_fc3"], p["b_fc3"] = xavier(ks[12], 1, H), bias(ks[13], H, 1)
    p["w_attn"] = xavier(ks[14], 1, H)       # self.W (1, H); xavier since ndim > 1
    return p


# ----------------------------------------------------------------------------- pure-JAX reference (mirrors PyTorch, f32)
def ref_forward(static, dynamic, p):
    sh = jnp.einsum("hc,bcs->bhs", p["w_se"], static) + p["b_se"][None, :, None]
    dh = jnp.einsum("hc,bcs->bhs", p["w_de"], dynamic[:, 1:2, :]) + p["b_de"][None, :, None]
    B, H, S = sh.shape
    last_hh = jnp.zeros((B, H), jnp.float32)
    for _ in range(3):
        last_hh = last_hh @ p["w_pq"].T + p["b_pq"]
        lb = last_hh[:, :, None]
        sh = jnp.einsum("oh,bhs->bos", p["w_e"], sh) + p["b_e"][None, :, None]
        dh = jnp.einsum("oh,bhs->bos", p["w_pd"], dh) + p["b_pd"][None, :, None]
        hidden = sh + dh + lb
        attns = jnp.einsum("h,bhs->bs", p["w_attn"][0], jnp.tanh(hidden))
        attns = jax.nn.softmax(attns, axis=-1)
        last_hh = jnp.einsum("bhs,bs->bh", sh, attns)
    out = jax.nn.relu(last_hh @ p["w_fc1"].T + p["b_fc1"])
    out = out @ p["w_fc3"].T + p["b_fc3"]
    return out[:, 0]


# ----------------------------------------------------------------------------- main
if __name__ == "__main__":
    B, STATIC_SIZE, DYN_CHANNELS, SEQ, HIDDEN = 16, 4, 2, 8, 32
    DYNAMIC_SIZE = 1   # forward only feeds dynamic[:, 1:2, :] to the dynamic encoder

    key = jax.random.PRNGKey(0)
    k_static, k_dyn, k_params = jax.random.split(key, 3)

    static = jax.random.normal(k_static, (B, STATIC_SIZE, SEQ), jnp.float32)
    dynamic = jax.random.normal(k_dyn, (B, DYN_CHANNELS, SEQ), jnp.float32)
    params = init_params(k_params, STATIC_SIZE, DYNAMIC_SIZE, HIDDEN)
    packed = pack_params(params)   # weight fusion / transposition done once

    out = jax.block_until_ready(
        state_critic_forward(static, dynamic, packed))    # heuristic -> Bt=8, grid=(2,)
    ref = jax.block_until_ready(ref_forward(static, dynamic, params))

    assert out.shape == (B,), out.shape
    # all-f32 weights + exact softmax divide => much tighter tolerance than before
    assert jnp.allclose(out, ref, atol=1e-3, rtol=1e-3), (out, ref)
    print("KERNEL_OK")
</pallas_src>

<mosaic_0001>
module attributes {stable_mosaic.version = 11 : i64} {
  func.func @state_critic_kernel(%arg0: i32, %arg1: memref<64x6xf32, #tpu.memory_space<vmem>>, %arg2: memref<3x6x32xf32, #tpu.memory_space<vmem>>, %arg3: memref<2x32x32xf32, #tpu.memory_space<vmem>>, %arg4: memref<11x32xf32, #tpu.memory_space<vmem>>, %arg5: memref<1x1x8xf32, #tpu.memory_space<vmem>>) attributes {dimension_semantics = [#tpu.dimension_semantics<parallel>], iteration_bounds = array<i64: 2>, scalar_prefetch = 0 : i64, scratch_operands = 0 : i64, tpu.core_type = #tpu.core_type<tc>, window_params = [{transform_indices = @transform_0, window_bounds = array<i64: 64, 6>}, {pipeline_mode = #tpu.pipeline_mode<synchronous>, transform_indices = @transform_1, window_bounds = array<i64: 3, 6, 32>}, {pipeline_mode = #tpu.pipeline_mode<synchronous>, transform_indices = @transform_2, window_bounds = array<i64: 2, 32, 32>}, {pipeline_mode = #tpu.pipeline_mode<synchronous>, transform_indices = @transform_3, window_bounds = array<i64: 11, 32>}, {transform_indices = @transform_4, window_bounds = array<i64: 1, 1, 8>}]} {
    %c0 = arith.constant 0 : index
    %c0_0 = arith.constant 0 : index
    %0 = vector.load %arg1[%c0, %c0_0] : memref<64x6xf32, #tpu.memory_space<vmem>>, vector<64x6xf32>
    %c0_1 = arith.constant 0 : index
    %c0_2 = arith.constant 0 : index
    %1 = vector.load %arg4[%c0_1, %c0_2] : memref<11x32xf32, #tpu.memory_space<vmem>>, vector<11x32xf32>
    %c0_3 = arith.constant 0 : index
    %c0_4 = arith.constant 0 : index
    %c0_5 = arith.constant 0 : index
    %2 = vector.load %arg3[%c0_3, %c0_4, %c0_5] : memref<2x32x32xf32, #tpu.memory_space<vmem>>, vector<1x32x32xf32>
    %3 = vector.shape_cast %2 : vector<1x32x32xf32> to vector<32x32xf32>
    %c1 = arith.constant 1 : index
    %c0_6 = arith.constant 0 : index
    %c0_7 = arith.constant 0 : index
    %4 = vector.load %arg3[%c1, %c0_6, %c0_7] : memref<2x32x32xf32, #tpu.memory_space<vmem>>, vector<1x32x32xf32>
    %5 = vector.shape_cast %4 : vector<1x32x32xf32> to vector<32x32xf32>
    %6 = vector.extract_strided_slice %1 {offsets = [6, 0], sizes = [1, 32], strides = [1, 1]} : vector<11x32xf32> to vector<1x32xf32>
    %7 = vector.extract_strided_slice %1 {offsets = [7, 0], sizes = [1, 32], strides = [1, 1]} : vector<11x32xf32> to vector<1x32xf32>
    %8 = vector.extract_strided_slice %0 {offsets = [0, 4], sizes = [64, 1], strides = [1, 1]} : vector<64x6xf32> to vector<64x1xf32>
    %9 = vector.shape_cast %8 : vector<64x1xf32> to vector<8x8x1xf32>
    %10 = vector.shape_cast %6 : vector<1x32xf32> to vector<1x32xf32>
    %11 = vector.broadcast %10 : vector<1x32xf32> to vector<8x32xf32>
    %c0_8 = arith.constant 0 : index
    %c0_9 = arith.constant 0 : index
    %c0_10 = arith.constant 0 : index
    %12 = vector.load %arg2[%c0_8, %c0_9, %c0_10] : memref<3x6x32xf32, #tpu.memory_space<vmem>>, vector<1x6x32xf32>
    %13 = vector.shape_cast %12 : vector<1x6x32xf32> to vector<6x32xf32>
    %cst = arith.constant dense<0.000000e+00> : vector<64x32xf32>
    %14 = tpu.matmul %0, %13, %cst {dimension_numbers = #tpu.dot_dimension_numbers<[1], [0], [0], [1], [0, 0, 1, 1], [], []>} : vector<64x6xf32>, vector<6x32xf32>, vector<64x32xf32> -> vector<64x32xf32>
    %15 = vector.shape_cast %14 : vector<64x32xf32> to vector<8x8x32xf32>
    %16 = vector.shape_cast %11 : vector<8x32xf32> to vector<8x1x32xf32>
    %17 = vector.broadcast %16 : vector<8x1x32xf32> to vector<8x8x32xf32>
    %18 = arith.addf %15, %17 : vector<8x8x32xf32>
    %19 = math.tanh %18 : vector<8x8x32xf32>
    %20 = vector.shape_cast %7 : vector<1x32xf32> to vector<1x1x32xf32>
    %21 = vector.broadcast %20 : vector<1x1x32xf32> to vector<8x8x32xf32>
    %22 = arith.mulf %19, %21 : vector<8x8x32xf32>
    %cst_11 = arith.constant dense<0.000000e+00> : vector<8x8xf32>
    %23 = vector.multi_reduction <add>, %22, %cst_11 [2] : vector<8x8x32xf32> to vector<8x8xf32>
    %cst_12 = arith.constant dense<0xFF800000> : vector<8xf32>
    %24 = vector.multi_reduction <maximumf>, %23, %cst_12 [1] : vector<8x8xf32> to vector<8xf32>
    %25 = vector.shape_cast %24 : vector<8xf32> to vector<8x1xf32>
    %26 = vector.broadcast %25 : vector<8x1xf32> to vector<8x8xf32>
    %27 = arith.subf %23, %26 : vector<8x8xf32>
    %28 = math.exp %27 : vector<8x8xf32>
    %cst_13 = arith.constant dense<0.000000e+00> : vector<8xf32>
    %29 = vector.multi_reduction <add>, %28, %cst_13 [1] : vector<8x8xf32> to vector<8xf32>
    %30 = vector.shape_cast %29 : vector<8xf32> to vector<8x1xf32>
    %31 = vector.broadcast %30 : vector<8x1xf32> to vector<8x8xf32>
    %32 = arith.divf %28, %31 : vector<8x8xf32>
    %33 = vector.shape_cast %32 : vector<8x8xf32> to vector<8x8x1xf32>
    %34 = vector.broadcast %33 : vector<8x8x1xf32> to vector<8x8x32xf32>
    %35 = arith.mulf %15, %34 : vector<8x8x32xf32>
    %cst_14 = arith.constant dense<0.000000e+00> : vector<8x32xf32>
    %36 = vector.multi_reduction <add>, %35, %cst_14 [1] : vector<8x8x32xf32> to vector<8x32xf32>
    %37 = arith.mulf %9, %33 : vector<8x8x1xf32>
    %cst_15 = arith.constant dense<0.000000e+00> : vector<8x1xf32>
    %38 = vector.multi_reduction <add>, %37, %cst_15 [1] : vector<8x8x1xf32> to vector<8x1xf32>
    %39 = vector.extract_strided_slice %1 {offsets = [0, 0], sizes = [1, 32], strides = [1, 1]} : vector<11x32xf32> to vector<1x32xf32>
    %40 = vector.broadcast %38 : vector<8x1xf32> to vector<8x32xf32>
    %41 = vector.broadcast %39 : vector<1x32xf32> to vector<8x32xf32>
    %42 = arith.mulf %40, %41 : vector<8x32xf32>
    %43 = arith.subf %36, %42 : vector<8x32xf32>
    %44 = vector.extract_strided_slice %1 {offsets = [3, 0], sizes = [1, 32], strides = [1, 1]} : vector<11x32xf32> to vector<1x32xf32>
    %45 = vector.broadcast %44 : vector<1x32xf32> to vector<8x32xf32>
    %46 = arith.subf %43, %45 : vector<8x32xf32>
    %cst_16 = arith.constant dense<0.000000e+00> : vector<8x32xf32>
    %47 = tpu.matmul %46, %3, %cst_16 {dimension_numbers = #tpu.dot_dimension_numbers<[1], [0], [0], [1], [0, 0, 1, 1], [], []>} : vector<8x32xf32>, vector<32x32xf32>, vector<8x32xf32> -> vector<8x32xf32>
    %48 = vector.broadcast %6 : vector<1x32xf32> to vector<8x32xf32>
    %49 = arith.addf %47, %48 : vector<8x32xf32>
    %c1_17 = arith.constant 1 : index
    %c0_18 = arith.constant 0 : index
    %c0_19 = arith.constant 0 : index
    %50 = vector.load %arg2[%c1_17, %c0_18, %c0_19] : memref<3x6x32xf32, #tpu.memory_space<vmem>>, vector<1x6x32xf32>
    %51 = vector.shape_cast %50 : vector<1x6x32xf32> to vector<6x32xf32>
    %cst_20 = arith.constant dense<0.000000e+00> : vector<64x32xf32>
    %52 = tpu.matmul %0, %51, %cst_20 {dimension_numbers = #tpu.dot_dimension_numbers<[1], [0], [0], [1], [0, 0, 1, 1], [], []>} : vector<64x6xf32>, vector<6x32xf32>, vector<64x32xf32> -> vector<64x32xf32>
    %53 = vector.shape_cast %52 : vector<64x32xf32> to vector<8x8x32xf32>
    %54 = vector.shape_cast %49 : vector<8x32xf32> to vector<8x1x32xf32>
    %55 = vector.broadcast %54 : vector<8x1x32xf32> to vector<8x8x32xf32>
    %56 = arith.addf %53, %55 : vector<8x8x32xf32>
    %57 = math.tanh %56 : vector<8x8x32xf32>
    %58 = vector.shape_cast %7 : vector<1x32xf32> to vector<1x1x32xf32>
    %59 = vector.broadcast %58 : vector<1x1x32xf32> to vector<8x8x32xf32>
    %60 = arith.mulf %57, %59 : vector<8x8x32xf32>
    %cst_21 = arith.constant dense<0.000000e+00> : vector<8x8xf32>
    %61 = vector.multi_reduction <add>, %60, %cst_21 [2] : vector<8x8x32xf32> to vector<8x8xf32>
    %cst_22 = arith.constant dense<0xFF800000> : vector<8xf32>
    %62 = vector.multi_reduction <maximumf>, %61, %cst_22 [1] : vector<8x8xf32> to vector<8xf32>
    %63 = vector.shape_cast %62 : vector<8xf32> to vector<8x1xf32>
    %64 = vector.broadcast %63 : vector<8x1xf32> to vector<8x8xf32>
    %65 = arith.subf %61, %64 : vector<8x8xf32>
    %66 = math.exp %65 : vector<8x8xf32>
    %cst_23 = arith.constant dense<0.000000e+00> : vector<8xf32>
    %67 = vector.multi_reduction <add>, %66, %cst_23 [1] : vector<8x8xf32> to vector<8xf32>
    %68 = vector.shape_cast %67 : vector<8xf32> to vector<8x1xf32>
    %69 = vector.broadcast %68 : vector<8x1xf32> to vector<8x8xf32>
    %70 = arith.divf %66, %69 : vector<8x8xf32>
    %71 = vector.shape_cast %70 : vector<8x8xf32> to vector<8x8x1xf32>
    %72 = vector.broadcast %71 : vector<8x8x1xf32> to vector<8x8x32xf32>
    %73 = arith.mulf %53, %72 : vector<8x8x32xf32>
    %cst_24 = arith.constant dense<0.000000e+00> : vector<8x32xf32>
    %74 = vector.multi_reduction <add>, %73, %cst_24 [1] : vector<8x8x32xf32> to vector<8x32xf32>
    %75 = arith.mulf %9, %71 : vector<8x8x1xf32>
    %cst_25 = arith.constant dense<0.000000e+00> : vector<8x1xf32>
    %76 = vector.multi_reduction <add>, %75, %cst_25 [1] : vector<8x8x1xf32> to vector<8x1xf32>
    %77 = vector.extract_strided_slice %1 {offsets = [1, 0], sizes = [1, 32], strides = [1, 1]} : vector<11x32xf32> to vector<1x32xf32>
    %78 = vector.broadcast %76 : vector<8x1xf32> to vector<8x32xf32>
    %79 = vector.broadcast %77 : vector<1x32xf32> to vector<8x32xf32>
    %80 = arith.mulf %78, %79 : vector<8x32xf32>
    %81 = arith.subf %74, %80 : vector<8x32xf32>
    %82 = vector.extract_strided_slice %1 {offsets = [4, 0], sizes = [1, 32], strides = [1, 1]} : vector<11x32xf32> to vector<1x32xf32>
    %83 = vector.broadcast %82 : vector<1x32xf32> to vector<8x32xf32>
    %84 = arith.subf %81, %83 : vector<8x32xf32>
    %cst_26 = arith.constant dense<0.000000e+00> : vector<8x32xf32>
    %85 = tpu.matmul %84, %3, %cst_26 {dimension_numbers = #tpu.dot_dimension_numbers<[1], [0], [0], [1], [0, 0, 1, 1], [], []>} : vector<8x32xf32>, vector<32x32xf32>, vector<8x32xf32> -> vector<8x32xf32>
    %86 = vector.broadcast %6 : vector<1x32xf32> to vector<8x32xf32>
    %87 = arith.addf %85, %86 : vector<8x32xf32>
    %c2 = arith.constant 2 : index
    %c0_27 = arith.constant 0 : index
    %c0_28 = arith.constant 0 : index
    %88 = vector.load %arg2[%c2, %c0_27, %c0_28] : memref<3x6x32xf32, #tpu.memory_space<vmem>>, vector<1x6x32xf32>
    %89 = vector.shape_cast %88 : vector<1x6x32xf32> to vector<6x32xf32>
    %cst_29 = arith.constant dense<0.000000e+00> : vector<64x32xf32>
    %90 = tpu.matmul %0, %89, %cst_29 {dimension_numbers = #tpu.dot_dimension_numbers<[1], [0], [0], [1], [0, 0, 1, 1], [], []>} : vector<64x6xf32>, vector<6x32xf32>, vector<64x32xf32> -> vector<64x32xf32>
    %91 = vector.shape_cast %90 : vector<64x32xf32> to vector<8x8x32xf32>
    %92 = vector.shape_cast %87 : vector<8x32xf32> to vector<8x1x32xf32>
    %93 = vector.broadcast %92 : vector<8x1x32xf32> to vector<8x8x32xf32>
    %94 = arith.addf %91, %93 : vector<8x8x32xf32>
    %95 = math.tanh %94 : vector<8x8x32xf32>
    %96 = vector.shape_cast %7 : vector<1x32xf32> to vector<1x1x32xf32>
    %97 = vector.broadcast %96 : vector<1x1x32xf32> to vector<8x8x32xf32>
    %98 = arith.mulf %95, %97 : vector<8x8x32xf32>
    %cst_30 = arith.constant dense<0.000000e+00> : vector<8x8xf32>
    %99 = vector.multi_reduction <add>, %98, %cst_30 [2] : vector<8x8x32xf32> to vector<8x8xf32>
    %cst_31 = arith.constant dense<0xFF800000> : vector<8xf32>
    %100 = vector.multi_reduction <maximumf>, %99, %cst_31 [1] : vector<8x8xf32> to vector<8xf32>
    %101 = vector.shape_cast %100 : vector<8xf32> to vector<8x1xf32>
    %102 = vector.broadcast %101 : vector<8x1xf32> to vector<8x8xf32>
    %103 = arith.subf %99, %102 : vector<8x8xf32>
    %104 = math.exp %103 : vector<8x8xf32>
    %cst_32 = arith.constant dense<0.000000e+00> : vector<8xf32>
    %105 = vector.multi_reduction <add>, %104, %cst_32 [1] : vector<8x8xf32> to vector<8xf32>
    %106 = vector.shape_cast %105 : vector<8xf32> to vector<8x1xf32>
    %107 = vector.broadcast %106 : vector<8x1xf32> to vector<8x8xf32>
    %108 = arith.divf %104, %107 : vector<8x8xf32>
    %109 = vector.shape_cast %108 : vector<8x8xf32> to vector<8x8x1xf32>
    %110 = vector.broadcast %109 : vector<8x8x1xf32> to vector<8x8x32xf32>
    %111 = arith.mulf %91, %110 : vector<8x8x32xf32>
    %cst_33 = arith.constant dense<0.000000e+00> : vector<8x32xf32>
    %112 = vector.multi_reduction <add>, %111, %cst_33 [1] : vector<8x8x32xf32> to vector<8x32xf32>
    %113 = arith.mulf %9, %109 : vector<8x8x1xf32>
    %cst_34 = arith.constant dense<0.000000e+00> : vector<8x1xf32>
    %114 = vector.multi_reduction <add>, %113, %cst_34 [1] : vector<8x8x1xf32> to vector<8x1xf32>
    %115 = vector.extract_strided_slice %1 {offsets = [2, 0], sizes = [1, 32], strides = [1, 1]} : vector<11x32xf32> to vector<1x32xf32>
    %116 = vector.broadcast %114 : vector<8x1xf32> to vector<8x32xf32>
    %117 = vector.broadcast %115 : vector<1x32xf32> to vector<8x32xf32>
    %118 = arith.mulf %116, %117 : vector<8x32xf32>
    %119 = arith.subf %112, %118 : vector<8x32xf32>
    %120 = vector.extract_strided_slice %1 {offsets = [5, 0], sizes = [1, 32], strides = [1, 1]} : vector<11x32xf32> to vector<1x32xf32>
    %121 = vector.broadcast %120 : vector<1x32xf32> to vector<8x32xf32>
    %122 = arith.subf %119, %121 : vector<8x32xf32>
    %cst_35 = arith.constant dense<0.000000e+00> : vector<8x32xf32>
    %123 = tpu.matmul %122, %5, %cst_35 {dimension_numbers = #tpu.dot_dimension_numbers<[1], [0], [0], [1], [0, 0, 1, 1], [], []>} : vector<8x32xf32>, vector<32x32xf32>, vector<8x32xf32> -> vector<8x32xf32>
    %124 = vector.extract_strided_slice %1 {offsets = [8, 0], sizes = [1, 32], strides = [1, 1]} : vector<11x32xf32> to vector<1x32xf32>
    %125 = vector.broadcast %124 : vector<1x32xf32> to vector<8x32xf32>
    %126 = arith.addf %123, %125 : vector<8x32xf32>
    %cst_36 = arith.constant 0.000000e+00 : f32
    %127 = vector.broadcast %cst_36 : f32 to vector<8x32xf32>
    %128 = arith.maximumf %126, %127 : vector<8x32xf32>
    %129 = vector.extract_strided_slice %1 {offsets = [9, 0], sizes = [1, 32], strides = [1, 1]} : vector<11x32xf32> to vector<1x32xf32>
    %130 = tpu.transpose %128, [1, 0] : vector<8x32xf32> -> vector<32x8xf32>
    %cst_37 = arith.constant dense<0.000000e+00> : vector<1x8xf32>
    %131 = tpu.matmul %129, %130, %cst_37 {dimension_numbers = #tpu.dot_dimension_numbers<[1], [0], [0], [1], [0, 0, 1, 1], [], []>} : vector<1x32xf32>, vector<32x8xf32>, vector<1x8xf32> -> vector<1x8xf32>
    %132 = vector.extract_strided_slice %1 {offsets = [10, 0], sizes = [1, 1], strides = [1, 1]} : vector<11x32xf32> to vector<1x1xf32>
    %133 = vector.broadcast %132 : vector<1x1xf32> to vector<1x8xf32>
    %134 = arith.addf %131, %133 : vector<1x8xf32>
    %135 = vector.shape_cast %134 : vector<1x8xf32> to vector<1x1x8xf32>
    %c0_38 = arith.constant 0 : index
    %c0_39 = arith.constant 0 : index
    %c0_40 = arith.constant 0 : index
    %136 = vector.load %arg5[%c0_38, %c0_39, %c0_40] : memref<1x1x8xf32, #tpu.memory_space<vmem>>, vector<1x1x8xf32>
    tpu.vector_store %arg5[%c0_38, %c0_39, %c0_40], %135 {strides = array<i32>} : memref<1x1x8xf32, #tpu.memory_space<vmem>>, vector<1x1x8xf32>,
    return
  }
  func.func @transform_0(%arg0: i32) -> (i32, i32) {
    %c0_i32 = arith.constant 0 : i32
    %c0_i32_0 = arith.constant 0 : i32
    return %arg0, %c0_i32 : i32, i32
  }
  func.func @transform_1(%arg0: i32) -> (i32, i32, i32) {
    %c0_i32 = arith.constant 0 : i32
    %c0_i32_0 = arith.constant 0 : i32
    %c0_i32_1 = arith.constant 0 : i32
    %c0_i32_2 = arith.constant 0 : i32
    return %c0_i32, %c0_i32_0, %c0_i32_1 : i32, i32, i32
  }
  func.func @transform_2(%arg0: i32) -> (i32, i32, i32) {
    %c0_i32 = arith.constant 0 : i32
    %c0_i32_0 = arith.constant 0 : i32
    %c0_i32_1 = arith.constant 0 : i32
    %c0_i32_2 = arith.constant 0 : i32
    return %c0_i32, %c0_i32_0, %c0_i32_1 : i32, i32, i32
  }
  func.func @transform_3(%arg0: i32) -> (i32, i32) {
    %c0_i32 = arith.constant 0 : i32
    %c0_i32_0 = arith.constant 0 : i32
    %c0_i32_1 = arith.constant 0 : i32
    return %c0_i32, %c0_i32_0 : i32, i32
  }
  func.func @transform_4(%arg0: i32) -> (i32, i32, i32) {
    %c0_i32 = arith.constant 0 : i32
    %c0_i32_0 = arith.constant 0 : i32
    %c0_i32_1 = arith.constant 0 : i32
    return %arg0, %c0_i32, %c0_i32_0 : i32, i32, i32
  }
}

</mosaic_0001>

<bundles_post_ra>
// kernel: tpu_custom_call.1
= control target key start
LH: loop header
LB: loop body
LE: loop exit
PB: predicated region body
PF: predicated region fallthrough
CT: control target
= control target key end

     0   :  { %9 = vsyncpa [#allocation3], 0  ;;  %s4315_s0 = inlined_call_operand.vmem [shape: f32[128,6], index: 0, kind: input, shape index: {}]   ;;  %s4316_s1 = inlined_call_operand.vmem [shape: f32[3,6,32], index: 1, kind: input, shape index: {}]   ;;  %s4317_s2 = inlined_call_operand.vmem [shape: f32[2,32,32], index: 2, kind: input, shape index: {}]   ;;  %s4318_s3 = inlined_call_operand.vmem [shape: f32[11,32], index: 3, kind: input, shape index: {}]   ;;  %s4319_s4 = inlined_call_operand.hbm [shape: f32[2,1,8], index: 4, kind: output, shape index: {}]  }
   0x1   :  { %11 = vsyncpa [#allocation3 + $0x1], 0  ;;  %s3389_s15 = smov 0   ;;  %s3391_s16 = smov 0  }
   0x2   :  { %s3393_s17 = smov 0   ;;  %s3395_s18 = smov 0  }
   0x3 LB: > { %s3410_s19 = sadd.s32 4294967295, %s3354_s18   ;;  %s2890_s20 = sadd.s32 4294967294, %s3354_s18   ;;  %s3354_s18 = sphi %s3395_s18, %s4325_s18   ;;  %s3350_s17 = sphi %s3393_s17, %s4324_s17   ;;  %s3346_s16 = sphi %s3391_s16, %s4323_s16   ;;  %s3342_s15 = sphi %s3389_s15, %s4322_s15  }
   0x4   : > { %s3414_s21 = sadd.s32 1, %s3354_s18   ;;  %s113_s22 = sadd.s32 1, %s3350_s17 }
   0x5   : > { %s110_s23 = ssub.s32 %s3354_s18, %s3414_s21  ;;  %p123_p0 = scmp.ne.s32.totalorder %s3350_s17, %s3346_s16 }
   0x6   : > { %p111_p1 = scmp.eq.s32.totalorder %s110_s23, 0  ;;  %p124_p2 = scmp.eq.s32.totalorder %s3410_s19, 1 }
   0x7   : > { %p129_p3 = scmp.ne.s32.totalorder %s3346_s16, %s3342_s15  ;;  %p130_p4 = scmp.eq.s32.totalorder %s2890_s20, 1 }
   0x8   : > { %s3425_s24 = scalar_select %p111_p1, %s3350_s17, %s113_s22  }
   0x9   : > { %p3427_p5 = por %p124_p2, %p123_p0  ;;  %p3431_p6 = por %p130_p4, %p129_p3 }
   0xa   : > { %p2893_p7 = scmp.ge.s32.totalorder %s3354_s18, 1  ;;  %p166_p8 = scmp.lt.s32.totalorder %s3354_s18, 3 }
   0xc   : > { %p167_p9 = pnand %p2893_p7, %p166_p8 }
   0xd   : > { %v216_v0 = vld [vmem:[%s4316_s1] sm:$0x3f] (!%p167_p9)  ;;  %vm242_vm0 = vcmask (!%p167_p9), 1045504   ;;  %s2894_s29 = sshll.u32 (!%p167_p9), %s3410_s19, 3  ;;  %vm217_vm1 = vcmask (!%p167_p9), 48128   ;;  %v351_v9 = vlaneseq (!%p167_p9)  ;;  %vm383_vm2 = vcmask (!%p167_p9), 261120  }
   0xe   : > { %170 = sbr.rel (%p167_p9) target bundleno = 3963 (0xf7b), region = 36  ;;  %2981 = vmatprep.subr.msk.mxu0 (!%p167_p9), %vm242_vm0, %v216_v0  ;;  %p192_p10 = scmp.lt.s32.totalorder (!%p167_p9), %s2894_s29, 15  ;;  %v3497_v12 = vld [vmem:[%s4318_s3] sm:$0xff] (!%p167_p9)  ;;  %vm450_vm3 = vcmask (!%p167_p9), 1041409   ;;  %vm452_vm4 = vcmask (!%p167_p9), 1042434   ;;  %vm454_vm5 = vcmask (!%p167_p9), 1043459  }
   0xf   : > { %2982 = vmatpush3.msk.msra.mxu0 (!%p167_p9), %vm242_vm0, %v216_v0  ;;  %v3489_v10 = vshrl.u32 (!%p167_p9), %v351_v9, 7  ;;  %v417_v56 = vand.u32 (!%p167_p9), 127, %v351_v9  ;;  %vm456_vm6 = vcmask (!%p167_p9), 1044484   ;;  %vm458_vm7 = vcmask (!%p167_p9), 1045509   ;;  %s3357_s10 = smov (!%p167_p9), 4   ;;  %s189_s27 = sand.u32 (!%p167_p9), 1, %s3346_s16  }
  0x10   : > { %vm460_vm8 = vcmask (!%p167_p9), 1046534   ;;  %vm462_vm9 = vcmask (!%p167_p9), 1047559   ;;  %vm465_vm10 = vcmask (!%p167_p9), 64512   ;;  %vm802_vm11 = vcmask (!%p167_p9), 39968   ;;  %s2934_s28 = sshll.u32 (!%p167_p9), %s3410_s19, 4  ;;  %s2823_s8 = scalar_lea.sflag (!%p167_p9), [#allocation3], %s189_s27 }
  0x11   : > { %v3492_v11 = vsub.s32 (!%p167_p9), 6, %v3489_v10  ;;  %v3518_v21 = vsub.s32 (!%p167_p9), 7, %v3489_v10  ;;  %v3560_v58 = vsub.s32 (!%p167_p9), %v417_v56, %v3489_v10  ;;  %v3600_v56 = vsub.s32 (!%p167_p9), 5, %v3489_v10  ;;  %s3363_s19 = smov (!%p167_p9), [#allocation2]  }
  0x12   : > { %vm3360_vm12 = vmmov (!%p167_p9), 0   ;;  %vm2820_vm13 = vcmask (!%p167_p9), 57344  }
  0x13   : > { %v3501_v13 = vrot.slane (!%p167_p9), %v3497_v12, %v3492_v11  ;;  %v3530_v26 = vrot.slane (!%p167_p9), %v3497_v12, %v3518_v21 }
  0x15   : > { %s4327_s29 = smov (!%p192_p10, %s2894_s29), 15 }
  0x16   : > { %s2895_s30 = sshll.u32 %s4327_s29, 3  ;;  %s190_s29 = scalar_lea.vmem [#allocation2], %s189_s27 }
  0x17   : > { %s3446_s7 = scalar_lea.vmem %s4315_s0, %s2895_s30  ;;  %s2835_s30 = sshll.u32 %s190_s29, 4  ;;  %s4275_s30 = int_to_ptr.vmem [resolvable:$true] %s2835_s30 }
  0x18   : > { %v3449_v1 = vld [vmem:[%s3446_s7] sm:$0xff]  ;;  %v3452_v2 = vld [vmem:[%s3446_s7 + $0x8] sm:$0xff]  ;;  %v3455_v3 = vld [vmem:[%s3446_s7 + $0x10] sm:$0xff]  ;;  %s3292_s9 = scalar_lea.vmem %s4275_s30, 16 }
  0x19   : > { %2983 = vmatprep.mubr.msk.f32.mxu0 %vm217_vm1, %v3449_v1  ;;  %v3464_v4 = vld [vmem:[%s3446_s7 + $0x18] sm:$0xff]  ;;  %v3467_v5 = vld [vmem:[%s3446_s7 + $0x20] sm:$0xff]  ;;  %v3474_v6 = vld [vmem:[%s3446_s7 + $0x28] sm:$0xff]  ;;  %p3293_p11 = scmp.ne.s32.totalorder %s4275_s30, %s3292_s9 }
  0x1a   : > { %2984 = vmatmul.mubr.msk.f32.vlgmr.msra.gmra.mrb[0].mxu0 %vm217_vm1, %v3452_v2  ;;  %v3477_v7 = vld [vmem:[%s3446_s7 + $0x30] sm:$0xff]  ;;  %v3484_v8 = vld [vmem:[%s3446_s7 + $0x38] sm:$0xff] }
  0x1b   : > { %2986 = vmatprep.mubr.msk.f32.mxu0 %vm217_vm1, %v3455_v3  ;;  %p3294_p12 = pnand %p3293_p11, %p3427_p5 }
  0x1d   : > { %p3295_p13 = pneg %p3294_p12 }
  0x1e   : > { %2987 = vmatmul.mubr.msk.f32.gmra.mrb[2].mxu0 %vm217_vm1, %v3464_v4 }
  0x1f   : > { %2989 = vmatprep.mubr.msk.f32.mxu0 %vm217_vm1, %v3467_v5 }
  0x22   : > { %2990 = vmatmul.mubr.msk.f32.gmra.mrb[4].mxu0 %vm217_vm1, %v3474_v6 }
  0x23   : > { %2992 = vmatprep.mubr.msk.f32.mxu0 %vm217_vm1, %v3477_v7 }
  0x26   : > { %2993 = vmatmul.mubr.msk.f32.gmra.mrb[6].mxu0 %vm217_vm1, %v3484_v8 }
  0xed   : > { %v3503_v14 = vpop.f32.mrb[0].mxu0 }
  0xee   : > { %v356_v15 = vadd.f32 %v3503_v14, %v3501_v13  ;;  %v3507_v16 = vpop.f32.mrb[1].mxu0 }
  0xef   : > { %v355_v17 = vadd.f32 %v3501_v13, %v3507_v16 }
  0xf0   : > { %3139 = vtanh.f32 %v356_v15 }
  0xf1   : > { %3141 = vtanh.f32 %v355_v17  ;;  %v3511_v18 = vpop.f32.mrb[2].mxu0 }
  0xf2   : > { %v358_v19 = vadd.f32 %v3511_v18, %v3501_v13  ;;  %v3515_v20 = vpop.f32.mrb[3].mxu0 }
  0xf3   : > { %v357_v22 = vadd.f32 %v3501_v13, %v3515_v20 }
  0xf4   : > { %3143 = vtanh.f32 %v358_v19 }
  0xf5   : > { %3145 = vtanh.f32 %v357_v22  ;;  %v3522_v23 = vpop.f32.mrb[4].mxu0 }
  0xf6   : > { %v360_v24 = vadd.f32 %v3522_v23, %v3501_v13  ;;  %v3526_v25 = vpop.f32.mrb[5].mxu0 }
  0xf7   : > { %v359_v27 = vadd.f32 %v3501_v13, %v3526_v25 }
  0xf8   : > { %3147 = vtanh.f32 %v360_v24 }
  0xf9   : > { %3149 = vtanh.f32 %v359_v27  ;;  %v3534_v28 = vpop.f32.mrb[6].mxu0 }
  0xfa   : > { %v3140_v29 = vpop.eup %3139  ;;  %v362_v30 = vadd.f32 %v3534_v28, %v3501_v13  ;;  %v3538_v31 = vpop.f32.mrb[7].mxu0 }
  0xfb   : > { %v3142_v32 = vpop.eup %3141  ;;  %v361_v33 = vadd.f32 %v3501_v13, %v3538_v31  ;;  %v376_v34 = vmul.f32 %v3140_v29, %v3530_v26 }
  0xfc   : > { %3151 = vtanh.f32 %v362_v30  ;;  %v375_v36 = vmul.f32 %v3142_v32, %v3530_v26 }
  0xfd   : > { %3153 = vtanh.f32 %v361_v33  ;;  %v387_v35 = vsel %vm383_vm2, %v376_v34, 0.0 }
  0xfe   : > { %v3144_v37 = vpop.eup %3143  ;;  %388 = vadd.xlane.f32.xlu0 %v387_v35  ;;  %v384_v40 = vsel %vm383_vm2, %v375_v36, 0.0 }
  0xff   : > { %v3146_v38 = vpop.eup %3145  ;;  %v378_v39 = vmul.f32 %v3144_v37, %v3530_v26 }
 0x100   : > { %v377_v42 = vmul.f32 %v3146_v38, %v3530_v26 }
 0x101   : > { %v393_v41 = vsel %vm383_vm2, %v378_v39, 0.0 }
 0x102   : > { %v3148_v43 = vpop.eup %3147  ;;  %385 = vadd.xlane.f32.xlu0 %v384_v40  ;;  %394 = vadd.xlane.f32.xlu1 %v393_v41  ;;  %v390_v46 = vsel %vm383_vm2, %v377_v42, 0.0  ;;  %v3356_v40 = vmov 0   ;;  %v3581_v41 = vsub.s32 0, %v3489_v10  ;;  %v3584_v42 = vsub.s32 1, %v3489_v10 }
 0x103   : > { %v3150_v44 = vpop.eup %3149  ;;  %v380_v47 = vmul.f32 %v3148_v43, %v3530_v26  ;;  %3126 = vset.pattern.permute.xlu0 %v3356_v40  ;;  %3125 = vset.pattern.permute.xlu1 %v3356_v40  ;;  %v3587_v43 = vsub.s32 2, %v3489_v10 }
 0x104   : > { %v379_v45 = vmul.f32 %v3150_v44, %v3530_v26  ;;  %v3590_v44 = vsub.s32 3, %v3489_v10 }
 0x105   : > { %v399_v52 = vsel %vm383_vm2, %v380_v47, 0.0 }
 0x106   : > { %v3152_v48 = vpop.eup %3151  ;;  %391 = vadd.xlane.f32.xlu1 %v390_v46  ;;  %v396_v49 = vsel %vm383_vm2, %v379_v45, 0.0 }
 0x107   : > { %v3154_v50 = vpop.eup %3153  ;;  %397 = vadd.xlane.f32.xlu0 %v396_v49  ;;  %v382_v53 = vmul.f32 %v3152_v48, %v3530_v26 }
 0x108   : > { %v381_v51 = vmul.f32 %v3154_v50, %v3530_v26 }
 0x109   : > { %v405_v55 = vsel %vm383_vm2, %v382_v53, 0.0 }
 0x10a   : > { %400 = vadd.xlane.f32.xlu1 %v399_v52  ;;  %v402_v54 = vsel %vm383_vm2, %v381_v51, 0.0  ;;  %v3596_v51 = vsub.s32 4, %v3489_v10 }
 0x10b   : > { %403 = vadd.xlane.f32.xlu0 %v402_v54 }
 0x10e   : > { %406 = vadd.xlane.f32.xlu1 %v405_v55 }
 0x18b   : > { %v389_v57 = vpop.xlane.xlu0 %388 }
 0x18c   : > { %v425_v62 = vrot.slane %v389_v57, %v3560_v58 }
 0x18f   : > { %v386_v59 = vpop.xlane.xlu0 %385  ;;  %v395_v60 = vpop.xlane.xlu1 %394 }
 0x190   : > { %v421_v61 = vrot.slane %v386_v59, %v3560_v58  ;;  %v433_v9 = vrot.slane %v395_v60, %v3560_v58 }
 0x192   : > { %v451_v17 = vsel %vm450_vm3, %v425_v62, %v421_v61 }
 0x193   : > { %v392_v63 = vpop.xlane.xlu1 %391 }
 0x194   : > { %v429_v0 = vrot.slane %v392_v63, %v3560_v58  ;;  %v398_v15 = vpop.xlane.xlu0 %397 }
 0x195   : > { %v437_v19 = vrot.slane %v398_v15, %v3560_v58 }
 0x196   : > { %v453_v22 = vsel %vm452_vm4, %v429_v0, %v451_v17 }
 0x197   : > { %v455_v24 = vsel %vm454_vm5, %v433_v9, %v453_v22  ;;  %v401_v27 = vpop.xlane.xlu1 %400 }
 0x198   : > { %v457_v29 = vsel %vm456_vm6, %v437_v19, %v455_v24  ;;  %v441_v30 = vrot.slane %v401_v27, %v3560_v58  ;;  %v404_v32 = vpop.xlane.xlu0 %403 }
 0x199   : > { %v445_v33 = vrot.slane %v404_v32, %v3560_v58 }
 0x19a   : > { %v459_v34 = vsel %vm458_vm7, %v441_v30, %v457_v29 }
 0x19b   : > { %v407_v35 = vpop.xlane.xlu1 %406  ;;  %v461_v37 = vsel %vm460_vm8, %v445_v33, %v459_v34 }
 0x19c   : > { %v449_v36 = vrot.slane %v407_v35, %v3560_v58 }
 0x19e   : > { %v463_v38 = vsel %vm462_vm9, %v449_v36, %v461_v37 }
 0x19f   : > { %v466_v39 = vsel %vm465_vm10, %v463_v38, -inf }
 0x1a0   : > { %467 = vmax.xlane.f32.xlu0 %v466_v39 }
 0x22d   : > { %v468_v45 = vpop.xlane.xlu0 %467 }
 0x22e   : > { %v473_v46 = vrot.slane %v468_v45, %v3581_v41  ;;  %v477_v47 = vrot.slane %v468_v45, %v3584_v42  ;;  %v481_v48 = vrot.slane %v468_v45, %v3587_v43  ;;  %v485_v52 = vrot.slane %v468_v45, %v3590_v44 }
 0x22f   : > { %v489_v61 = vrot.slane %v468_v45, %v3596_v51  ;;  %v497_v9 = vrot.slane %v468_v45, %v3492_v11 }
 0x230   : > { %v511_v49 = vsub.f32 %v389_v57, %v477_v47  ;;  %v510_v50 = vsub.f32 %v386_v59, %v473_v46  ;;  %v512_v53 = vsub.f32 %v392_v63, %v481_v48  ;;  %v513_v0 = vsub.f32 %v395_v60, %v485_v52 }
 0x231   : > { %v493_v57 = vrot.slane %v468_v45, %v3600_v56  ;;  %v514_v17 = vsub.f32 %v398_v15, %v489_v61  ;;  %v501_v60 = vrot.slane %v468_v45, %v3518_v21  ;;  %v516_v30 = vsub.f32 %v404_v32, %v497_v9 }
 0x232   : > { %v520_v54 = vmul.f32 1.442695, %v511_v49  ;;  %v518_v55 = vmul.f32 1.442695, %v510_v50  ;;  %v522_v62 = vmul.f32 1.442695, %v512_v53 }
 0x233   : > { %v524_v59 = vmul.f32 1.442695, %v513_v0  ;;  %v526_v63 = vmul.f32 1.442695, %v514_v17  ;;  %v515_v19 = vsub.f32 %v401_v27, %v493_v57  ;;  %v530_v15 = vmul.f32 1.442695, %v516_v30 }
 0x234   : > { %3155 = vpow2.f32 %v520_v54  ;;  %v517_v27 = vsub.f32 %v407_v35, %v501_v60 }
 0x235   : > { %3157 = vpow2.f32 %v518_v55  ;;  %v528_v29 = vmul.f32 1.442695, %v515_v19 }
 0x236   : > { %3159 = vpow2.f32 %v522_v62  ;;  %v532_v36 = vmul.f32 1.442695, %v517_v27 }
 0x237   : > { %3161 = vpow2.f32 %v524_v59 }
 0x238   : > { %3163 = vpow2.f32 %v526_v63 }
 0x239   : > { %3165 = vpow2.f32 %v528_v29 }
 0x23a   : > { %3167 = vpow2.f32 %v530_v15 }
 0x23b   : > { %3169 = vpow2.f32 %v532_v36 }
 0x23e   : > { %v3605_v22 = vpop.eup %3155 }
 0x23f   : > { %v3607_v24 = vpop.eup %3157  ;;  %546 = vperm.xlu0 %3126, %v3605_v22  }
 0x240   : > { %543 = vperm.xlu1 %3125, %v3607_v24   ;;  %v3612_v33 = vpop.eup %3159 }
 0x241   : > { %v3615_v34 = vpop.eup %3161 }
 0x242   : > { %v3618_v37 = vpop.eup %3163 }
 0x243   : > { %v3166_v38 = vpop.eup %3165 }
 0x244   : > { %549 = vperm.xlu1 %3125, %v3612_v33   ;;  %v3621_v32 = vpop.eup %3167 }
 0x245   : > { %v3170_v39 = vpop.eup %3169 }
 0x248   : > { %552 = vperm.xlu1 %3125, %v3615_v34  }
 0x24c   : > { %555 = vperm.xlu1 %3125, %v3618_v37  }
 0x250   : > { %558 = vperm.xlu1 %3125, %v3166_v38  }
 0x254   : > { %561 = vperm.xlu1 %3125, %v3621_v32  }
 0x258   : > { %564 = vperm.xlu1 %3125, %v3170_v39  }
 0x2be   : > { %v547_v48 = vpop.permute.xlu0 %546 }
 0x2bf   : > { %v544_v35 = vpop.permute.xlu1 %543  ;;  %v573_v50 = vrot.slane %v547_v48, %v3560_v58 }
 0x2c0   : > { %v569_v52 = vrot.slane %v544_v35, %v3560_v58 }
 0x2c2   : > { %v598_v62 = vsel %vm450_vm3, %v573_v50, %v569_v52 }
 0x2c3   : > { %v550_v45 = vpop.permute.xlu1 %549 }
 0x2c4   : > { %v577_v53 = vrot.slane %v550_v45, %v3560_v58 }
 0x2c6   : > { %v599_v57 = vsel %vm452_vm4, %v577_v53, %v598_v62 }
 0x2c7   : > { %v553_v46 = vpop.permute.xlu1 %552 }
 0x2c8   : > { %v581_v54 = vrot.slane %v553_v46, %v3560_v58 }
 0x2ca   : > { %v600_v17 = vsel %vm454_vm5, %v581_v54, %v599_v57 }
 0x2cb   : > { %v556_v47 = vpop.permute.xlu1 %555 }
 0x2cc   : > { %v585_v55 = vrot.slane %v556_v47, %v3560_v58 }
 0x2ce   : > { %v601_v9 = vsel %vm456_vm6, %v585_v55, %v600_v17 }
 0x2cf   : > { %v559_v49 = vpop.permute.xlu1 %558 }
 0x2d0   : > { %v589_v0 = vrot.slane %v559_v49, %v3560_v58 }
 0x2d2   : > { %v602_v19 = vsel %vm458_vm7, %v589_v0, %v601_v9 }
 0x2d3   : > { %v562_v61 = vpop.permute.xlu1 %561 }
 0x2d4   : > { %v593_v59 = vrot.slane %v562_v61, %v3560_v58 }
 0x2d6   : > { %v603_v29 = vsel %vm460_vm8, %v593_v59, %v602_v19 }
 0x2d7   : > { %v565_v63 = vpop.permute.xlu1 %564 }
 0x2d8   : > { %v597_v60 = vrot.slane %v565_v63, %v3560_v58 }
 0x2da   : > { %v604_v30 = vsel %vm462_vm9, %v597_v60, %v603_v29 }
 0x2db   : > { %v606_v15 = vsel %vm465_vm10, %v604_v30, 0.0 }
 0x2dc   : > { %607 = vadd.xlane.f32.xlu1 %v606_v15 }
 0x369   : > { %v608_v27 = vpop.xlane.xlu1 %607 }
 0x36a   : > { %v617_v36 = vrot.slane %v608_v27, %v3584_v42  ;;  %v633_v35 = vrot.slane %v608_v27, %v3600_v56  ;;  %v621_v45 = vrot.slane %v608_v27, %v3587_v43  ;;  %v641_v46 = vrot.slane %v608_v27, %v3518_v21 }
 0x36b   : > { %v613_v47 = vrot.slane %v608_v27, %v3581_v41  ;;  %v625_v48 = vrot.slane %v608_v27, %v3590_v44  ;;  %v629_v50 = vrot.slane %v608_v27, %v3596_v51  ;;  %v637_v57 = vrot.slane %v608_v27, %v3492_v11 }
 0x36c   : > { %3171 = vrcp.f32 %v617_v36 }
 0x36d   : > { %3173 = vrcp.f32 %v633_v35 }
 0x36e   : > { %3175 = vrcp.f32 %v621_v45 }
 0x36f   : > { %3177 = vrcp.f32 %v641_v46 }
 0x370   : > { %3179 = vrcp.f32 %v613_v47 }
 0x371   : > { %3181 = vrcp.f32 %v625_v48 }
 0x372   : > { %3183 = vrcp.f32 %v629_v50 }
 0x373   : > { %3185 = vrcp.f32 %v637_v57 }
 0x376   : > { %v3172_v49 = vpop.eup %3171 }
 0x377   : > { %v3174_v52 = vpop.eup %3173  ;;  %v653_v53 = vmul.f32 %v3172_v49, %v3605_v22 }
 0x378   : > { %v3176_v54 = vpop.eup %3175  ;;  %v661_v61 = vmul.f32 %v3174_v52, %v3166_v38 }
 0x379   : > { %673 = vperm.xlu1 %3125, %v653_v53   ;;  %772 = vrot.lane.b32.xlu0 %v653_v53, %s3357_s10  ;;  %v3178_v55 = vpop.eup %3177  ;;  %v655_v62 = vmul.f32 %v3176_v54, %v3612_v33  ;;  %v3358_v33 = vmov 4  }
 0x37a   : > { %v3180_v0 = vpop.eup %3179  ;;  %v665_v59 = vmul.f32 %v3178_v55, %v3170_v39 }
 0x37b   : > { %v651_v17 = vmul.f32 %v3180_v0, %v3607_v24  ;;  %v3182_v22 = vpop.eup %3181 }
 0x37c   : > { %v657_v9 = vmul.f32 %v3182_v22, %v3615_v34  ;;  %v3184_v63 = vpop.eup %3183 }
 0x37d   : > { %693 = vperm.xlu1 %3125, %v661_v61   ;;  %774 = vrot.lane.b32.xlu0 %v655_v62, %s3357_s10  ;;  %v659_v38 = vmul.f32 %v3184_v63, %v3618_v37  ;;  %v3186_v39 = vpop.eup %3185 }
 0x37e   : > { %v663_v24 = vmul.f32 %v3186_v39, %v3621_v32 }
 0x381   : > { %703 = vperm.xlu1 %3125, %v665_v59   ;;  %770 = vrot.lane.b32.xlu0 %v651_v17, %s3357_s10 }
 0x385   : > { %776 = vrot.lane.b32.xlu0 %v657_v9, %s3357_s10  ;;  %3128 = vset.pattern.permute.xlu1 %v3358_v33 }
 0x389   : > { %778 = vrot.lane.b32.xlu0 %v659_v38, %s3357_s10 }
 0x38d   : > { %780 = vrot.lane.b32.xlu0 %v661_v61, %s3357_s10 }
 0x391   : > { %782 = vrot.lane.b32.xlu0 %v663_v24, %s3357_s10 }
 0x395   : > { %784 = vrot.lane.b32.xlu0 %v665_v59, %s3357_s10 }
 0x399   : > { %678 = vperm.xlu0 %3126, %v655_v62  }
 0x39d   : > { %668 = vperm.xlu0 %3126, %v651_v17  }
 0x3a1   : > { %683 = vperm.xlu0 %3126, %v657_v9  }
 0x3a5   : > { %688 = vperm.xlu0 %3126, %v659_v38  }
 0x3a9   : > { %698 = vperm.xlu0 %3126, %v663_v24  }
 0x3ad   : > { %3127 = vset.pattern.permute.xlu0 %v3358_v33 }
 0x3eb   : > { %v773_v34 = vpop.permute.xlu0 %772 }
 0x3ec   : > { %v795_v37 = vmul.f32 %v773_v34, %v3452_v2 }
 0x3ee   : > { %v810_v19 = vsel %vm802_vm11, %v795_v37, 0.0 }
 0x3ef   : > { %v811_v60 = vrot.slane %v810_v19, 4  ;;  %v775_v29 = vpop.permute.xlu0 %774 }
 0x3f0   : > { %v796_v32 = vmul.f32 %v775_v29, %v3455_v3 }
 0x3f1   : > { %v812_v30 = vadd.f32 %v811_v60, %v810_v19 }
 0x3f2   : > { %v817_v15 = vsel %vm802_vm11, %v796_v32, 0.0 }
 0x3f3   : > { %v813_v27 = vrot.slane %v812_v30, 2  ;;  %v818_v36 = vrot.slane %v817_v15, 4  ;;  %v771_v35 = vpop.permute.xlu0 %770 }
 0x3f4   : > { %v794_v45 = vmul.f32 %v771_v35, %v3449_v1 }
 0x3f5   : > { %v819_v46 = vadd.f32 %v818_v36, %v817_v15  ;;  %v814_v47 = vadd.f32 %v813_v27, %v812_v30 }
 0x3f6   : > { %v803_v48 = vsel %vm802_vm11, %v794_v45, 0.0 }
 0x3f7   : > { %v820_v49 = vrot.slane %v819_v46, 2  ;;  %v804_v50 = vrot.slane %v803_v48, 4  ;;  %v777_v52 = vpop.permute.xlu0 %776  ;;  %v815_v53 = vrot.slane %v814_v47, 1 }
 0x3f8   : > { %v797_v54 = vmul.f32 %v777_v52, %v3464_v4 }
 0x3f9   : > { %v805_v55 = vadd.f32 %v804_v50, %v803_v48  ;;  %v816_v61 = vadd.f32 %v815_v53, %v814_v47  ;;  %v821_v62 = vadd.f32 %v820_v49, %v819_v46 }
 0x3fa   : > { %v824_v0 = vsel %vm802_vm11, %v797_v54, 0.0 }
 0x3fb   : > { %v806_v57 = vrot.slane %v805_v55, 2  ;;  %v825_v59 = vrot.slane %v824_v0, 4  ;;  %866 = vperm.xlu0 %3127, %v816_v61   ;;  %v779_v17 = vpop.permute.xlu0 %778  ;;  %v822_v22 = vrot.slane %v821_v62, 1 }
 0x3fc   : > { %v798_v9 = vmul.f32 %v779_v17, %v3467_v5 }
 0x3fd   : > { %v826_v63 = vadd.f32 %v825_v59, %v824_v0  ;;  %v823_v38 = vadd.f32 %v822_v22, %v821_v62  ;;  %v807_v39 = vadd.f32 %v806_v57, %v805_v55 }
 0x3fe   : > { %v831_v24 = vsel %vm802_vm11, %v798_v9, 0.0 }
 0x3ff   : > { %v827_v34 = vrot.slane %v826_v63, 2  ;;  %v832_v37 = vrot.slane %v831_v24, 4  ;;  %871 = vperm.xlu1 %3128, %v823_v38   ;;  %v781_v19 = vpop.permute.xlu0 %780  ;;  %v808_v60 = vrot.slane %v807_v39, 1 }
 0x400   : > { %v799_v29 = vmul.f32 %v781_v19, %v3474_v6 }
 0x401   : > { %v833_v32 = vadd.f32 %v832_v37, %v831_v24  ;;  %v809_v30 = vadd.f32 %v808_v60, %v807_v39  ;;  %v828_v15 = vadd.f32 %v827_v34, %v826_v63 }
 0x402   : > { %v838_v27 = vsel %vm802_vm11, %v799_v29, 0.0 }
 0x403   : > { %v834_v36 = vrot.slane %v833_v32, 2  ;;  %v839_v35 = vrot.slane %v838_v27, 4  ;;  %861 = vperm.xlu1 %3128, %v809_v30   ;;  %v783_v45 = vpop.permute.xlu0 %782  ;;  %v829_v46 = vrot.slane %v828_v15, 1  ;;  %v207_v30 = vld [vmem:[%s4317_s2] sm:$0xff] }
 0x404   : > { %v800_v47 = vmul.f32 %v783_v45, %v3477_v7  ;;  %v210_v45 = vld [vmem:[%s4317_s2 + $0x18] sm:$0xff] }
 0x405   : > { %v840_v48 = vadd.f32 %v839_v35, %v838_v27  ;;  %v830_v49 = vadd.f32 %v829_v46, %v828_v15  ;;  %v835_v50 = vadd.f32 %v834_v36, %v833_v32  ;;  %v208_v15 = vld [vmem:[%s4317_s2 + $0x8] sm:$0xff]  ;;  %v209_v27 = vld [vmem:[%s4317_s2 + $0x10] sm:$0xff]  ;;  %v3359_v36 = vmov 0.0|0.0  }
 0x406   : > { %v845_v52 = vsel %vm802_vm11, %v800_v47, 0.0  ;;  %3061 = vmatprep.subr.bf16.mxu1 %v3359_v36  ;;  %v3062_v35 = vpack.c.bf16 %v208_v15, %v207_v30  ;;  %v3361_v46 = vmov 0.0   ;;  %3067 = vmatprep.subr.bf16.mxu0 %v3359_v36  ;;  %v3065_v47 = vpack.c.bf16 %v210_v45, %v209_v27 }
 0x407   : > { %v841_v53 = vrot.slane %v840_v48, 2  ;;  %v846_v54 = vrot.slane %v845_v52, 4  ;;  %876 = vperm.xlu0 %3127, %v830_v49   ;;  %v785_v55 = vpop.permute.xlu0 %784  ;;  %v836_v61 = vrot.slane %v835_v50, 1  ;;  %3003 = vmatprep.mubr.msk.f32.mxu1 %vm3360_vm12, %v3361_v46 }
 0x408   : > { %v801_v62 = vmul.f32 %v785_v55, %v3484_v8  ;;  %3028 = vmatprep.mubr.msk.f32.mxu0 %vm3360_vm12, %v3361_v46  ;;  %3063 = vmatpush3.bf16.msra.mxu1 %v3062_v35 }
 0x409   : > { %v847_v0 = vadd.f32 %v846_v54, %v845_v52  ;;  %v837_v57 = vadd.f32 %v836_v61, %v835_v50  ;;  %v842_v59 = vadd.f32 %v841_v53, %v840_v48  ;;  %3069 = vmatpush3.bf16.msra.mxu0 %v3062_v35  ;;  %3064 = vmatprep.subr.bf16.mxu1 %v3359_v36  ;;  %v3705_v48 = vld [vmem:[%s4316_s1 + $0x8] sm:$0x3f]  ;;  %v674_v50 = vpop.permute.xlu1 %673 }
 0x40a   : > { %v852_v17 = vsel %vm802_vm11, %v801_v62, 0.0  ;;  %3070 = vmatprep.subr.bf16.mxu0 %v3359_v36  ;;  %v707_v53 = vmul.f32 %v3503_v14, %v674_v50 }
 0x40b   : > { %v848_v22 = vrot.slane %v847_v0, 2  ;;  %v853_v9 = vrot.slane %v852_v17, 4  ;;  %881 = vperm.xlu1 %3128, %v837_v57   ;;  %v843_v63 = vrot.slane %v842_v59, 1 }
 0x40c   : > { %3066 = vmatpush3.bf16.msra.mxu1 %v3065_v47  ;;  %v721_v55 = vsel %vm383_vm2, %v707_v53, 0.0 }
 0x40d   : > { %v854_v38 = vadd.f32 %v853_v9, %v852_v17  ;;  %v844_v39 = vadd.f32 %v843_v63, %v842_v59  ;;  %v849_v24 = vadd.f32 %v848_v22, %v847_v0  ;;  %3072 = vmatpush3.bf16.msra.mxu0 %v3065_v47  ;;  %3006 = vmatprep.subr.msk.mxu1 %vm242_vm0, %v3705_v48  ;;  %v722_v57 = vrot.slane %v721_v55, 4 }
 0x40f   : > { %v855_v34 = vrot.slane %v854_v38, 2  ;;  %886 = vperm.xlu0 %3127, %v844_v39   ;;  %v850_v37 = vrot.slane %v849_v24, 1  ;;  %v723_v9 = vadd.f32 %v722_v57, %v721_v55  ;;  %v694_v39 = vpop.permute.xlu1 %693 }
 0x411   : > { %v851_v19 = vadd.f32 %v850_v37, %v849_v24  ;;  %v856_v60 = vadd.f32 %v855_v34, %v854_v38  ;;  %v724_v34 = vrot.slane %v723_v9, 2  ;;  %v711_v37 = vmul.f32 %v3522_v23, %v694_v39 }
 0x413   : > { %891 = vperm.xlu1 %3128, %v851_v19   ;;  %v857_v29 = vrot.slane %v856_v60, 1  ;;  %v749_v30 = vsel %vm383_vm2, %v711_v37, 0.0  ;;  %v704_v35 = vpop.permute.xlu1 %703 }
 0x414   : > { %v750_v50 = vrot.slane %v749_v30, 4 }
 0x415   : > { %v858_v32 = vadd.f32 %v857_v29, %v856_v60 }
 0x417   : > { %896 = vperm.xlu0 %3127, %v858_v32   ;;  %3129 = vset.pattern.permute.xlu1 %v3356_v40  ;;  %v725_v32 = vadd.f32 %v724_v34, %v723_v9 }
 0x418   : > { %v679_v49 = vpop.permute.xlu0 %678 }
 0x419   : > { %v708_v54 = vmul.f32 %v679_v49, %v3515_v20  ;;  %v726_v23 = vrot.slane %v725_v32, 1 }
 0x41b   : > { %3130 = vset.pattern.permute.xlu0 %v3356_v40  ;;  %v728_v61 = vsel %vm383_vm2, %v708_v54, 0.0 }
 0x41c   : > { %v669_v52 = vpop.permute.xlu0 %668  ;;  %v729_v59 = vrot.slane %v728_v61, 4 }
 0x41d   : > { %v706_v0 = vmul.f32 %v669_v52, %v3507_v16  ;;  %v713_v52 = vmul.f32 %v3534_v28, %v704_v35 }
 0x41e   : > { %v730_v38 = vadd.f32 %v729_v59, %v728_v61  ;;  %v751_v59 = vadd.f32 %v750_v50, %v749_v30 }
 0x41f   : > { %v714_v22 = vsel %vm383_vm2, %v706_v0, 0.0 }
 0x420   : > { %v684_v62 = vpop.permute.xlu0 %683  ;;  %v715_v14 = vrot.slane %v714_v22, 4  ;;  %v731_v19 = vrot.slane %v730_v38, 2  ;;  %v752_v37 = vrot.slane %v751_v59, 2 }
 0x421   : > { %v709_v17 = vmul.f32 %v3511_v18, %v684_v62 }
 0x422   : > { %v716_v60 = vadd.f32 %v715_v14, %v714_v22  ;;  %v732_v27 = vadd.f32 %v731_v19, %v730_v38  ;;  %v763_v22 = vsel %vm383_vm2, %v713_v52, 0.0  ;;  %v753_v35 = vadd.f32 %v752_v37, %v751_v59 }
 0x423   : > { %v735_v20 = vsel %vm383_vm2, %v709_v17, 0.0  ;;  %v727_v17 = vadd.f32 %v726_v23, %v725_v32  ;;  %v764_v19 = vrot.slane %v763_v22, 4 }
 0x424   : > { %v689_v63 = vpop.permute.xlu0 %688  ;;  %v736_v16 = vrot.slane %v735_v20, 4  ;;  %v717_v45 = vrot.slane %v716_v60, 2  ;;  %v733_v55 = vrot.slane %v732_v27, 1 }
 0x425   : > { %v710_v24 = vmul.f32 %v689_v63, %v3526_v25  ;;  %v3724_v25 = vrot.slane %v3497_v12, %v3581_v41 }
 0x426   : > { %v737_v15 = vadd.f32 %v736_v16, %v735_v20  ;;  %v718_v57 = vadd.f32 %v717_v45, %v716_v60  ;;  %v734_v38 = vadd.f32 %v733_v55, %v732_v27  ;;  %v765_v45 = vadd.f32 %v764_v19, %v763_v22 }
 0x427   : > { %v742_v29 = vsel %vm383_vm2, %v710_v24, 0.0 }
 0x428   : > { %v699_v18 = vpop.permute.xlu0 %698  ;;  %v743_v47 = vrot.slane %v742_v29, 4  ;;  %v738_v53 = vrot.slane %v737_v15, 2  ;;  %v719_v24 = vrot.slane %v718_v57, 1 }
 0x429   : > { %v712_v49 = vmul.f32 %v699_v18, %v3538_v31  ;;  %v3731_v31 = vrot.slane %v3497_v12, %v3590_v44 }
 0x42a   : > { %v744_v61 = vadd.f32 %v743_v47, %v742_v29  ;;  %v739_v9 = vadd.f32 %v738_v53, %v737_v15  ;;  %v720_v18 = vadd.f32 %v719_v24, %v718_v57  ;;  %v766_v57 = vrot.slane %v765_v45, 2 }
 0x42b   : > { %v756_v62 = vsel %vm383_vm2, %v712_v49, 0.0 }
 0x42c   : > { %v757_v63 = vrot.slane %v756_v62, 4  ;;  %v745_v39 = vrot.slane %v744_v61, 2  ;;  %v740_v29 = vrot.slane %v739_v9, 1 }
 0x42e   : > { %v758_v16 = vadd.f32 %v757_v63, %v756_v62  ;;  %v746_v30 = vadd.f32 %v745_v39, %v744_v61  ;;  %v741_v49 = vadd.f32 %v740_v29, %v739_v9  ;;  %v754_v63 = vrot.slane %v753_v35, 1 }
 0x430   : > { %v759_v47 = vrot.slane %v758_v16, 2 }
 0x47a   : > { %v867_v54 = vpop.permute.xlu0 %866 }
 0x47b   : > { %v904_v0 = vmul.f32 %v3724_v25, %v867_v54  ;;  %v747_v54 = vrot.slane %v746_v30, 1 }
 0x47d   : > { %v912_v14 = vsub.f32 %v727_v17, %v904_v0  ;;  %v748_v22 = vadd.f32 %v747_v54, %v746_v30 }
 0x47e   : > { %v872_v28 = vpop.permute.xlu1 %871 }
 0x47f   : > { %v905_v20 = vmul.f32 %v3724_v25, %v872_v28  ;;  %v924_v12 = vsub.f32 %v912_v14, %v3731_v31  ;;  %v760_v28 = vadd.f32 %v759_v47, %v758_v16  ;;  %v767_v14 = vadd.f32 %v766_v57, %v765_v45 }
 0x481   : > { %v913_v34 = vsub.f32 %v734_v38, %v905_v20  ;;  %v939_v50 = vrot.slane %v924_v12, 7  ;;  %v755_v20 = vadd.f32 %v754_v63, %v753_v35 }
 0x482   : > { %v862_v60 = vpop.permute.xlu1 %861 }
 0x483   : > { %v903_v32 = vmul.f32 %v3724_v25, %v862_v60  ;;  %v925_v15 = vsub.f32 %v913_v34, %v3731_v31  ;;  %v761_v60 = vrot.slane %v760_v28, 1 }
 0x485   : > { %v911_v27 = vsub.f32 %v720_v18, %v903_v32  ;;  %v941_v55 = vrot.slane %v925_v15, 6  ;;  %v768_v32 = vrot.slane %v767_v14, 1  ;;  %v762_v15 = vadd.f32 %v761_v60, %v760_v28 }
 0x486   : > { %v877_v23 = vpop.permute.xlu0 %876 }
 0x487   : > { %v923_v52 = vsub.f32 %v911_v27, %v3731_v31  ;;  %v906_v53 = vmul.f32 %v3724_v25, %v877_v23  ;;  %v769_v23 = vadd.f32 %v768_v32, %v767_v14 }
 0x489   : > { %v940_v62 = vsel %vm450_vm3, %v939_v50, %v923_v52  ;;  %v914_v0 = vsub.f32 %v741_v49, %v906_v53 }
 0x48a   : > { %v942_v61 = vsel %vm452_vm4, %v941_v55, %v940_v62  ;;  %v882_v17 = vpop.permute.xlu1 %881 }
 0x48b   : > { %v926_v59 = vsub.f32 %v914_v0, %v3731_v31  ;;  %v907_v9 = vmul.f32 %v3724_v25, %v882_v17 }
 0x48d   : > { %v943_v38 = vrot.slane %v926_v59, 5  ;;  %v915_v39 = vsub.f32 %v748_v22, %v907_v9 }
 0x48e   : > { %v887_v24 = vpop.permute.xlu0 %886 }
 0x48f   : > { %v944_v34 = vsel %vm454_vm5, %v943_v38, %v942_v61  ;;  %v927_v37 = vsub.f32 %v915_v39, %v3731_v31  ;;  %v908_v19 = vmul.f32 %v3724_v25, %v887_v24 }
 0x491   : > { %v945_v29 = vrot.slane %v927_v37, 4  ;;  %v916_v12 = vsub.f32 %v755_v20, %v908_v19 }
 0x492   : > { %v892_v18 = vpop.permute.xlu1 %891 }
 0x493   : > { %v946_v30 = vsel %vm456_vm6, %v945_v29, %v944_v34  ;;  %v928_v16 = vsub.f32 %v916_v12, %v3731_v31  ;;  %v909_v27 = vmul.f32 %v3724_v25, %v892_v18 }
 0x495   : > { %v947_v35 = vrot.slane %v928_v16, 3  ;;  %v917_v45 = vsub.f32 %v762_v15, %v909_v27 }
 0x496   : > { %v897_v47 = vpop.permute.xlu0 %896 }
 0x497   : > { %v929_v49 = vsub.f32 %v917_v45, %v3731_v31  ;;  %v910_v50 = vmul.f32 %v3724_v25, %v897_v47  ;;  %v948_v52 = vsel %vm458_vm7, %v947_v35, %v946_v30 }
 0x499   : > { %v949_v53 = vrot.slane %v929_v49, 2  ;;  %v918_v54 = vsub.f32 %v769_v23, %v910_v50 }
 0x49b   : > { %v930_v55 = vsub.f32 %v918_v54, %v3731_v31  ;;  %v950_v62 = vsel %vm460_vm8, %v949_v53, %v948_v52 }
 0x49d   : > { %v951_v0 = vrot.slane %v930_v55, 1 }
 0x49f   : > { %v952_v57 = vsel %vm462_vm9, %v951_v0, %v950_v62 }
 0x4a0   : > { %3004 = vmatmul.mubr.msk.f32.vlgmr.msra.gmra.mrb[0].mxu1 %vm383_vm2, %v952_v57 }
 0x4a1   : > { %3007 = vmatpush3.msk.msra.mxu1 %vm242_vm0, %v3705_v48  ;;  %3008 = vmatprep.mubr.msk.f32.mxu1 %vm217_vm1, %v3449_v1  ;;  %v3362_v1 = vmov 1966171168  }
 0x4a2   : > { %3073 = vmatprep.subr.bf16.mxu1 %v3359_v36 }
 0x4a4   : > { %3009 = vmatmul.mubr.msk.f32.vlgmr.msra.gmra.mrb[2].mxu1 %vm217_vm1, %v3452_v2  ;;  %v1138_v2 = vunpack.c.l.s4 %v3362_v1 }
 0x4a5   : > { %3011 = vmatprep.mubr.msk.f32.mxu1 %vm217_vm1, %v3455_v3 }
 0x4a6   : > { %v1139_v3 = vunpack.c.0.s8 %v1138_v2 }
 0x4a8   : > { %3012 = vmatmul.mubr.msk.f32.gmra.mrb[4].mxu1 %vm217_vm1, %v3464_v4  ;;  %v3779_v4 = vsub.s32 %v1139_v3, %v3489_v10 }
 0x4a9   : > { %3014 = vmatprep.mubr.msk.f32.mxu1 %vm217_vm1, %v3467_v5 }
 0x4ac   : > { %3015 = vmatmul.mubr.msk.f32.gmra.mrb[6].mxu1 %vm217_vm1, %v3474_v6 }
 0x4ad   : > { %3017 = vmatprep.mubr.msk.f32.mxu1 %vm217_vm1, %v3477_v7 }
 0x4b0   : > { %3018 = vmatmul.mubr.msk.f32.gmra.mrb[8].mxu1 %vm217_vm1, %v3484_v8 }
 0x4b1   : > { %3053 = vmatprep.mubr.msk.f32.mxu1 %vm3360_vm12, %v3361_v46 }
 0x573   : > { %v1021_v48 = vpop.f32.mrb[0].mxu1 }
 0x574   : > { %v1022_v5 = vadd.f32 %v1021_v48, %v3501_v13  ;;  %v3005_v25 = vpop.f32.mrb[1].mxu1 }
 0x576   : > { %v1136_v6 = vcombine.high %v1022_v5, %v1022_v5  ;;  %v1143_v31 = vrot.slane %v1022_v5, %v3779_v4 }
 0x577   : > { %v3783_v7 = vpop.f32.mrb[2].mxu1 }
 0x578   : > { %v1150_v8 = vrot.slane %v1136_v6, %v3779_v4  ;;  %v1151_v61 = vcombine.high %v1143_v31, %v1143_v31  ;;  %v1159_v17 = vrot.slane %v1143_v31, %v3779_v4  ;;  %v3787_v63 = vpop.f32.mrb[3].mxu1 }
 0x57a   : > { %v1152_v59 = vcombine.high %v1150_v8, %v1150_v8  ;;  %v1173_v10 = vrot.slane %v1151_v61, %v3779_v4  ;;  %v1188_v22 = vrot.slane %v1159_v17, %v3581_v41  ;;  %v1181_v9 = vcombine.high %v1159_v17, %v1159_v17 }
 0x57b   : > { %v3791_v28 = vpop.f32.mrb[4].mxu1  ;;  %v1166_v38 = vrot.slane %v1150_v8, %v3779_v4 }
 0x57c   : > { %v1192_v39 = vrot.slane %v1173_v10, %v3581_v41  ;;  %v1225_v14 = vadd.f32 %v1188_v22, %v3787_v63  ;;  %v1183_v20 = vcombine.high %v1173_v10, %v1173_v10  ;;  %v3796_v24 = vpop.f32.mrb[5].mxu1  ;;  %v1196_v34 = vrot.slane %v1181_v9, %v3581_v41 }
 0x57d   : > { %v1180_v37 = vrot.slane %v1152_v59, %v3779_v4  ;;  %v1204_v32 = vrot.slane %v1166_v38, %v3581_v41  ;;  %v1182_v16 = vcombine.high %v1166_v38, %v1166_v38 }
 0x57e   : > { %v1226_v19 = vadd.f32 %v3783_v7, %v1192_v39  ;;  %3187 = vtanh.f32 %v1225_v14  ;;  %v1200_v60 = vrot.slane %v1183_v20, %v3581_v41  ;;  %v1227_v29 = vadd.f32 %v1196_v34, %v3796_v24 }
 0x57f   : > { %v3803_v12 = vpop.f32.mrb[6].mxu1  ;;  %v1208_v18 = vrot.slane %v1180_v37, %v3581_v41  ;;  %v1184_v30 = vcombine.high %v1180_v37, %v1180_v37  ;;  %v1212_v23 = vrot.slane %v1182_v16, %v3581_v41 }
 0x580   : > { %3189 = vtanh.f32 %v1226_v19  ;;  %v1228_v15 = vadd.f32 %v3791_v28, %v1200_v60  ;;  %v3808_v27 = vpop.f32.mrb[7].mxu1 }
 0x581   : > { %3191 = vtanh.f32 %v1227_v29  ;;  %v1230_v35 = vadd.f32 %v3803_v12, %v1208_v18  ;;  %v1229_v45 = vadd.f32 %v1204_v32, %v3808_v27  ;;  %v1216_v47 = vrot.slane %v1184_v30, %v3581_v41 }
 0x582   : > { %3193 = vtanh.f32 %v1228_v15 }
 0x583   : > { %3195 = vtanh.f32 %v1230_v35  ;;  %v3813_v49 = vpop.f32.mrb[8].mxu1 }
 0x584   : > { %3197 = vtanh.f32 %v1229_v45  ;;  %v1232_v50 = vadd.f32 %v3813_v49, %v1216_v47  ;;  %v3817_v52 = vpop.f32.mrb[9].mxu1 }
 0x585   : > { %v1231_v53 = vadd.f32 %v1212_v23, %v3817_v52 }
 0x586   : > { %3199 = vtanh.f32 %v1232_v50 }
 0x587   : > { %3201 = vtanh.f32 %v1231_v53 }
 0x588   : > { %v3188_v54 = vpop.eup %3187 }
 0x589   : > { %v1241_v55 = vmul.f32 %v3188_v54, %v3530_v26 }
 0x58a   : > { %v3190_v62 = vpop.eup %3189 }
 0x58b   : > { %v3192_v0 = vpop.eup %3191  ;;  %v1249_v57 = vsel %vm383_vm2, %v1241_v55, 0.0  ;;  %v1242_v1 = vmul.f32 %v3190_v62, %v3530_v26 }
 0x58c   : > { %v3194_v2 = vpop.eup %3193  ;;  %1250 = vadd.xlane.f32.xlu1 %v1249_v57  ;;  %v1243_v25 = vmul.f32 %v3192_v0, %v3530_v26 }
 0x58d   : > { %v3196_v3 = vpop.eup %3195  ;;  %v1252_v48 = vsel %vm383_vm2, %v1242_v1, 0.0  ;;  %v1244_v5 = vmul.f32 %v3194_v2, %v3530_v26 }
 0x58e   : > { %v3198_v6 = vpop.eup %3197  ;;  %1253 = vadd.xlane.f32.xlu0 %v1252_v48  ;;  %v1246_v8 = vmul.f32 %v3196_v3, %v3530_v26  ;;  %v1255_v17 = vsel %vm383_vm2, %v1243_v25, 0.0 }
 0x58f   : > { %v1258_v31 = vsel %vm383_vm2, %v1244_v5, 0.0  ;;  %v1245_v59 = vmul.f32 %v3198_v6, %v3530_v26 }
 0x590   : > { %v3200_v61 = vpop.eup %3199  ;;  %1259 = vadd.xlane.f32.xlu1 %v1258_v31  ;;  %v1264_v22 = vsel %vm383_vm2, %v1246_v8, 0.0 }
 0x591   : > { %v3202_v10 = vpop.eup %3201  ;;  %v1248_v9 = vmul.f32 %v3200_v61, %v3530_v26  ;;  %v1261_v38 = vsel %vm383_vm2, %v1245_v59, 0.0 }
 0x592   : > { %1256 = vadd.xlane.f32.xlu0 %v1255_v17  ;;  %v1247_v39 = vmul.f32 %v3202_v10, %v3530_v26 }
 0x593   : > { %v1270_v14 = vsel %vm383_vm2, %v1248_v9, 0.0 }
 0x594   : > { %1265 = vadd.xlane.f32.xlu1 %v1264_v22  ;;  %v1267_v20 = vsel %vm383_vm2, %v1247_v39, 0.0 }
 0x596   : > { %1262 = vadd.xlane.f32.xlu0 %v1261_v38 }
 0x598   : > { %1271 = vadd.xlane.f32.xlu1 %v1270_v14 }
 0x59a   : > { %1268 = vadd.xlane.f32.xlu0 %v1267_v20 }
 0x619   : > { %v1251_v34 = vpop.xlane.xlu1 %1250 }
 0x61a   : > { %v1284_v29 = vrot.slane %v1251_v34, %v3560_v58 }
 0x61b   : > { %v1254_v37 = vpop.xlane.xlu0 %1253 }
 0x61c   : > { %v1288_v19 = vrot.slane %v1254_v37, %v3560_v58 }
 0x61d   : > { %v1260_v60 = vpop.xlane.xlu1 %1259 }
 0x61e   : > { %v1313_v30 = vsel %vm450_vm3, %v1288_v19, %v1284_v29  ;;  %v1296_v35 = vrot.slane %v1260_v60, %v3560_v58 }
 0x61f   : > { %v1257_v18 = vpop.xlane.xlu0 %1256 }
 0x620   : > { %v1292_v32 = vrot.slane %v1257_v18, %v3560_v58 }
 0x621   : > { %v1266_v16 = vpop.xlane.xlu1 %1265 }
 0x622   : > { %v1314_v15 = vsel %vm452_vm4, %v1292_v32, %v1313_v30  ;;  %v1304_v54 = vrot.slane %v1266_v16, %v3560_v58 }
 0x623   : > { %v1263_v45 = vpop.xlane.xlu0 %1262  ;;  %v1315_v23 = vsel %vm454_vm5, %v1296_v35, %v1314_v15 }
 0x624   : > { %v1300_v47 = vrot.slane %v1263_v45, %v3560_v58 }
 0x625   : > { %v1272_v53 = vpop.xlane.xlu1 %1271 }
 0x626   : > { %v1316_v50 = vsel %vm456_vm6, %v1300_v47, %v1315_v23  ;;  %v1312_v0 = vrot.slane %v1272_v53, %v3560_v58 }
 0x627   : > { %v1269_v55 = vpop.xlane.xlu0 %1268  ;;  %v1317_v57 = vsel %vm458_vm7, %v1304_v54, %v1316_v50 }
 0x628   : > { %v1308_v62 = vrot.slane %v1269_v55, %v3560_v58 }
 0x62a   : > { %v1318_v1 = vsel %vm460_vm8, %v1308_v62, %v1317_v57 }
 0x62b   : > { %v1319_v2 = vsel %vm462_vm9, %v1312_v0, %v1318_v1 }
 0x62c   : > { %v1321_v3 = vsel %vm465_vm10, %v1319_v2, -inf }
 0x62d   : > { %1322 = vmax.xlane.f32.xlu0 %v1321_v3 }
 0x6ba   : > { %v1323_v48 = vpop.xlane.xlu0 %1322 }
 0x6bb   : > { %v1328_v5 = vrot.slane %v1323_v48, %v3581_v41  ;;  %v1332_v25 = vrot.slane %v1323_v48, %v3584_v42  ;;  %v1336_v6 = vrot.slane %v1323_v48, %v3587_v43  ;;  %v1340_v31 = vrot.slane %v1323_v48, %v3590_v44 }
 0x6bc   : > { %v1344_v22 = vrot.slane %v1323_v48, %v3596_v51  ;;  %v1348_v39 = vrot.slane %v1323_v48, %v3600_v56  ;;  %v1352_v19 = vrot.slane %v1323_v48, %v3492_v11 }
 0x6bd   : > { %v1365_v8 = vsub.f32 %v1251_v34, %v1328_v5  ;;  %v1366_v61 = vsub.f32 %v1254_v37, %v1332_v25  ;;  %v1367_v17 = vsub.f32 %v1257_v18, %v1336_v6  ;;  %v1368_v9 = vsub.f32 %v1260_v60, %v1340_v31 }
 0x6be   : > { %v1369_v14 = vsub.f32 %v1263_v45, %v1344_v22  ;;  %v1370_v29 = vsub.f32 %v1266_v16, %v1348_v39  ;;  %v1356_v60 = vrot.slane %v1323_v48, %v3518_v21  ;;  %v1371_v32 = vsub.f32 %v1269_v55, %v1352_v19 }
 0x6bf   : > { %v1373_v59 = vmul.f32 1.442695, %v1365_v8  ;;  %v1375_v10 = vmul.f32 1.442695, %v1366_v61  ;;  %v1377_v38 = vmul.f32 1.442695, %v1367_v17 }
 0x6c0   : > { %v1379_v20 = vmul.f32 1.442695, %v1368_v9  ;;  %v1381_v34 = vmul.f32 1.442695, %v1369_v14  ;;  %v1383_v30 = vmul.f32 1.442695, %v1370_v29  ;;  %v1372_v35 = vsub.f32 %v1272_v53, %v1356_v60 }
 0x6c1   : > { %3203 = vpow2.f32 %v1373_v59  ;;  %v1385_v16 = vmul.f32 1.442695, %v1371_v32 }
 0x6c2   : > { %3205 = vpow2.f32 %v1375_v10  ;;  %v1387_v47 = vmul.f32 1.442695, %v1372_v35 }
 0x6c3   : > { %3207 = vpow2.f32 %v1377_v38 }
 0x6c4   : > { %3209 = vpow2.f32 %v1379_v20 }
 0x6c5   : > { %3211 = vpow2.f32 %v1381_v34 }
 0x6c6   : > { %3213 = vpow2.f32 %v1383_v30 }
 0x6c7   : > { %3215 = vpow2.f32 %v1385_v16 }
 0x6c8   : > { %3217 = vpow2.f32 %v1387_v47 }
 0x6cb   : > { %v3859_v37 = vpop.eup %3203 }
 0x6cc   : > { %v3861_v18 = vpop.eup %3205  ;;  %1398 = vperm.xlu1 %3129, %v3859_v37  }
 0x6cd   : > { %1401 = vperm.xlu0 %3130, %v3861_v18   ;;  %v3208_v15 = vpop.eup %3207 }
 0x6ce   : > { %v3866_v45 = vpop.eup %3209 }
 0x6cf   : > { %v3869_v23 = vpop.eup %3211 }
 0x6d0   : > { %1404 = vperm.xlu1 %3129, %v3208_v15   ;;  %v3872_v50 = vpop.eup %3213 }
 0x6d1   : > { %v3216_v54 = vpop.eup %3215 }
 0x6d2   : > { %v3875_v53 = vpop.eup %3217 }
 0x6d4   : > { %1407 = vperm.xlu1 %3129, %v3866_v45  }
 0x6d8   : > { %1410 = vperm.xlu1 %3129, %v3869_v23  }
 0x6dc   : > { %1413 = vperm.xlu1 %3129, %v3872_v50  }
 0x6e0   : > { %1416 = vperm.xlu1 %3129, %v3216_v54  }
 0x6e4   : > { %1419 = vperm.xlu1 %3129, %v3875_v53  }
 0x74b   : > { %v1399_v55 = vpop.permute.xlu1 %1398 }
 0x74c   : > { %v1402_v1 = vpop.permute.xlu0 %1401  ;;  %v1424_v48 = vrot.slane %v1399_v55, %v3560_v58 }
 0x74d   : > { %v1428_v3 = vrot.slane %v1402_v1, %v3560_v58 }
 0x74f   : > { %v1405_v62 = vpop.permute.xlu1 %1404  ;;  %v1453_v8 = vsel %vm450_vm3, %v1428_v3, %v1424_v48 }
 0x750   : > { %v1432_v5 = vrot.slane %v1405_v62, %v3560_v58 }
 0x752   : > { %v1454_v17 = vsel %vm452_vm4, %v1432_v5, %v1453_v8 }
 0x753   : > { %v1408_v0 = vpop.permute.xlu1 %1407 }
 0x754   : > { %v1436_v25 = vrot.slane %v1408_v0, %v3560_v58 }
 0x756   : > { %v1455_v10 = vsel %vm454_vm5, %v1436_v25, %v1454_v17 }
 0x757   : > { %v1411_v57 = vpop.permute.xlu1 %1410 }
 0x758   : > { %v1440_v6 = vrot.slane %v1411_v57, %v3560_v58 }
 0x75a   : > { %v1456_v22 = vsel %vm456_vm6, %v1440_v6, %v1455_v10 }
 0x75b   : > { %v1414_v2 = vpop.permute.xlu1 %1413 }
 0x75c   : > { %v1444_v61 = vrot.slane %v1414_v2, %v3560_v58 }
 0x75e   : > { %v1457_v38 = vsel %vm458_vm7, %v1444_v61, %v1456_v22 }
 0x75f   : > { %v1417_v31 = vpop.permute.xlu1 %1416 }
 0x760   : > { %v1448_v59 = vrot.slane %v1417_v31, %v3560_v58 }
 0x762   : > { %v1458_v14 = vsel %vm460_vm8, %v1448_v59, %v1457_v38  ;;  %v3924_v59 = vld [vmem:[%s3446_s7 + $0x10] sm:$0xff] }
 0x763   : > { %v1420_v9 = vpop.permute.xlu1 %1419 }
 0x764   : > { %v1452_v39 = vrot.slane %v1420_v9, %v3560_v58 }
 0x766   : > { %v1459_v20 = vsel %vm462_vm9, %v1452_v39, %v1458_v14 }
 0x767   : > { %v1461_v19 = vsel %vm465_vm10, %v1459_v20, 0.0  ;;  %v3929_v20 = vld [vmem:[%s3446_s7] sm:$0xff] }
 0x768   : > { %1462 = vadd.xlane.f32.xlu1 %v1461_v19 }
 0x7f5   : > { %v1463_v29 = vpop.xlane.xlu1 %1462 }
 0x7f6   : > { %v1476_v34 = vrot.slane %v1463_v29, %v3587_v43  ;;  %v1472_v60 = vrot.slane %v1463_v29, %v3584_v42  ;;  %v1492_v32 = vrot.slane %v1463_v29, %v3492_v11  ;;  %v1468_v30 = vrot.slane %v1463_v29, %v3581_v41 }
 0x7f7   : > { %v1480_v35 = vrot.slane %v1463_v29, %v3590_v44  ;;  %v1484_v62 = vrot.slane %v1463_v29, %v3596_v51  ;;  %v1488_v2 = vrot.slane %v1463_v29, %v3600_v56 }
 0x7f8   : > { %3219 = vrcp.f32 %v1476_v34 }
 0x7f9   : > { %3221 = vrcp.f32 %v1472_v60 }
 0x7fa   : > { %3223 = vrcp.f32 %v1492_v32 }
 0x7fb   : > { %3225 = vrcp.f32 %v1468_v30 }
 0x7fc   : > { %3227 = vrcp.f32 %v1480_v35 }
 0x7fd   : > { %3229 = vrcp.f32 %v1484_v62 }
 0x7fe   : > { %3231 = vrcp.f32 %v1488_v2 }
 0x802   : > { %v3220_v16 = vpop.eup %3219 }
 0x803   : > { %v3222_v47 = vpop.eup %3221  ;;  %v1510_v55 = vmul.f32 %v3220_v16, %v3208_v15 }
 0x804   : > { %v3224_v0 = vpop.eup %3223  ;;  %v1508_v57 = vmul.f32 %v3222_v47, %v3861_v18  ;;  %v1496_v18 = vrot.slane %v1463_v29, %v3518_v21  ;;  %v3934_v47 = vld [vmem:[%s3446_s7 + $0x18] sm:$0xff] }
 0x805   : > { %1533 = vperm.xlu1 %3129, %v1510_v55   ;;  %v1518_v1 = vmul.f32 %v3224_v0, %v3216_v54  ;;  %v3226_v3 = vpop.eup %3225 }
 0x806   : > { %1627 = vrot.lane.b32.xlu0 %v1508_v57, %s3357_s10  ;;  %v1506_v15 = vmul.f32 %v3226_v3, %v3859_v37  ;;  %v3228_v48 = vpop.eup %3227  ;;  %3233 = vrcp.f32 %v1496_v18  ;;  %v3939_v18 = vld [vmem:[%s3446_s7 + $0x20] sm:$0xff] }
 0x807   : > { %v1512_v5 = vmul.f32 %v3228_v48, %v3866_v45  ;;  %v3230_v54 = vpop.eup %3229 }
 0x808   : > { %v1514_v25 = vmul.f32 %v3230_v54, %v3869_v23  ;;  %v3232_v6 = vpop.eup %3231 }
 0x809   : > { %1553 = vperm.xlu1 %3129, %v1518_v1   ;;  %v1516_v37 = vmul.f32 %v3232_v6, %v3872_v50  ;;  %v3919_v50 = vld [vmem:[%s3446_s7 + $0x8] sm:$0xff] }
 0x80a   : > { %1629 = vrot.lane.b32.xlu0 %v1510_v55, %s3357_s10 }
 0x80d   : > { %3131 = vset.pattern.permute.xlu1 %v3358_v33 }
 0x80e   : > { %1625 = vrot.lane.b32.xlu0 %v1506_v15, %s3357_s10 }
 0x810   : > { %v3234_v31 = vpop.eup %3233 }
 0x811   : > { %v1520_v45 = vmul.f32 %v3234_v31, %v3875_v53 }
 0x812   : > { %1631 = vrot.lane.b32.xlu0 %v1512_v5, %s3357_s10 }
 0x816   : > { %1633 = vrot.lane.b32.xlu0 %v1514_v25, %s3357_s10 }
 0x81a   : > { %1635 = vrot.lane.b32.xlu0 %v1516_v37, %s3357_s10 }
 0x81e   : > { %1637 = vrot.lane.b32.xlu0 %v1518_v1, %s3357_s10 }
 0x822   : > { %1639 = vrot.lane.b32.xlu0 %v1520_v45, %s3357_s10 }
 0x826   : > { %1528 = vperm.xlu0 %3130, %v1508_v57  }
 0x82a   : > { %1523 = vperm.xlu0 %3130, %v1506_v15  }
 0x82e   : > { %1538 = vperm.xlu0 %3130, %v1512_v5  }
 0x832   : > { %1543 = vperm.xlu0 %3130, %v1514_v25  }
 0x836   : > { %1548 = vperm.xlu0 %3130, %v1516_v37  }
 0x83a   : > { %1558 = vperm.xlu0 %3130, %v1520_v45  }
 0x83e   : > { %3132 = vset.pattern.permute.xlu0 %v3358_v33 }
 0x878   : > { %v1628_v23 = vpop.permute.xlu0 %1627 }
 0x879   : > { %v1650_v8 = vmul.f32 %v3919_v50, %v1628_v23 }
 0x87b   : > { %v1664_v61 = vsel %vm802_vm11, %v1650_v8, 0.0  ;;  %v3944_v8 = vld [vmem:[%s3446_s7 + $0x28] sm:$0xff] }
 0x87c   : > { %v1665_v17 = vrot.slane %v1664_v61, 4  ;;  %v1630_v53 = vpop.permute.xlu0 %1629 }
 0x87d   : > { %v1651_v10 = vmul.f32 %v3924_v59, %v1630_v53 }
 0x87e   : > { %v1666_v22 = vadd.f32 %v1665_v17, %v1664_v61 }
 0x87f   : > { %v1671_v9 = vsel %vm802_vm11, %v1651_v10, 0.0 }
 0x880   : > { %v1667_v38 = vrot.slane %v1666_v22, 2  ;;  %v1672_v39 = vrot.slane %v1671_v9, 4  ;;  %v1626_v14 = vpop.permute.xlu0 %1625 }
 0x881   : > { %v1649_v19 = vmul.f32 %v3929_v20, %v1626_v14 }
 0x882   : > { %v1668_v29 = vadd.f32 %v1667_v38, %v1666_v22  ;;  %v1673_v34 = vadd.f32 %v1672_v39, %v1671_v9 }
 0x883   : > { %v1657_v60 = vsel %vm802_vm11, %v1649_v19, 0.0 }
 0x884   : > { %v1674_v32 = vrot.slane %v1673_v34, 2  ;;  %v1658_v30 = vrot.slane %v1657_v60, 4  ;;  %v1632_v35 = vpop.permute.xlu0 %1631  ;;  %v1669_v16 = vrot.slane %v1668_v29, 1 }
 0x885   : > { %v1652_v55 = vmul.f32 %v3934_v47, %v1632_v35 }
 0x886   : > { %v1675_v62 = vadd.f32 %v1674_v32, %v1673_v34  ;;  %v1659_v0 = vadd.f32 %v1658_v30, %v1657_v60  ;;  %v1670_v57 = vadd.f32 %v1669_v16, %v1668_v29  ;;  %v3949_v29 = vld [vmem:[%s3446_s7 + $0x30] sm:$0xff] }
 0x887   : > { %v1678_v1 = vsel %vm802_vm11, %v1652_v55, 0.0 }
 0x888   : > { %v1660_v2 = vrot.slane %v1659_v0, 2  ;;  %v1679_v3 = vrot.slane %v1678_v1, 4  ;;  %1720 = vperm.xlu1 %3131, %v1670_v57   ;;  %v1634_v15 = vpop.permute.xlu0 %1633  ;;  %v1676_v48 = vrot.slane %v1675_v62, 1  ;;  %v3954_v57 = vld [vmem:[%s3446_s7 + $0x38] sm:$0xff]  ;;  %s4273_s7 = scalar_lea.hbm %s4319_s4, %s2934_s28 }
 0x889   : > { %v1653_v5 = vmul.f32 %v3939_v18, %v1634_v15 }
 0x88a   : > { %v1661_v54 = vadd.f32 %v1660_v2, %v1659_v0  ;;  %v1680_v25 = vadd.f32 %v1679_v3, %v1678_v1  ;;  %v1677_v6 = vadd.f32 %v1676_v48, %v1675_v62 }
 0x88b   : > { %v1685_v37 = vsel %vm802_vm11, %v1653_v5, 0.0 }
 0x88c   : > { %v1681_v31 = vrot.slane %v1680_v25, 2  ;;  %v1686_v45 = vrot.slane %v1685_v37, 4  ;;  %1725 = vperm.xlu0 %3132, %v1677_v6   ;;  %v1636_v23 = vpop.permute.xlu0 %1635  ;;  %v1662_v17 = vrot.slane %v1661_v54, 1 }
 0x88d   : > { %v1654_v61 = vmul.f32 %v3944_v8, %v1636_v23 }
 0x88e   : > { %v1682_v53 = vadd.f32 %v1681_v31, %v1680_v25  ;;  %v1687_v10 = vadd.f32 %v1686_v45, %v1685_v37  ;;  %v1663_v9 = vadd.f32 %v1662_v17, %v1661_v54 }
 0x88f   : > { %v1692_v22 = vsel %vm802_vm11, %v1654_v61, 0.0 }
 0x890   : > { %v1688_v38 = vrot.slane %v1687_v10, 2  ;;  %v1693_v39 = vrot.slane %v1692_v22, 4  ;;  %v1638_v14 = vpop.permute.xlu0 %1637  ;;  %v1683_v19 = vrot.slane %v1682_v53, 1  ;;  %1715 = vperm.xlu1 %3131, %v1663_v9  }
 0x891   : > { %v1655_v34 = vmul.f32 %v3949_v29, %v1638_v14 }
 0x892   : > { %v1689_v60 = vadd.f32 %v1688_v38, %v1687_v10  ;;  %v1694_v32 = vadd.f32 %v1693_v39, %v1692_v22  ;;  %v1684_v30 = vadd.f32 %v1683_v19, %v1682_v53  ;;  %v3963_v22 = vld [vmem:[%s4316_s1 + $0x10] sm:$0x3f]  ;;  %v1534_v39 = vpop.permute.xlu1 %1533 }
 0x893   : > { %v1699_v35 = vsel %vm802_vm11, %v1655_v34, 0.0  ;;  %3031 = vmatprep.subr.msk.mxu0 %vm242_vm0, %v3963_v22  ;;  %v1563_v19 = vmul.f32 %v1534_v39, %v3796_v24 }
 0x894   : > { %v1695_v16 = vrot.slane %v1694_v32, 2  ;;  %v1700_v55 = vrot.slane %v1699_v35, 4  ;;  %v1640_v62 = vpop.permute.xlu0 %1639  ;;  %v1690_v0 = vrot.slane %v1689_v60, 1  ;;  %1730 = vperm.xlu1 %3131, %v1684_v30  }
 0x895   : > { %v1656_v1 = vmul.f32 %v3954_v57, %v1640_v62 }
 0x896   : > { %v1696_v2 = vadd.f32 %v1695_v16, %v1694_v32  ;;  %v1701_v3 = vadd.f32 %v1700_v55, %v1699_v35  ;;  %v1691_v15 = vadd.f32 %v1690_v0, %v1689_v60  ;;  %v1583_v32 = vsel %vm383_vm2, %v1563_v19, 0.0 }
 0x897   : > { %v1706_v48 = vsel %vm802_vm11, %v1656_v1, 0.0  ;;  %v1584_v16 = vrot.slane %v1583_v32, 4 }
 0x898   : > { %v1702_v5 = vrot.slane %v1701_v3, 2  ;;  %v1707_v54 = vrot.slane %v1706_v48, 4  ;;  %1735 = vperm.xlu0 %3132, %v1691_v15   ;;  %v1697_v25 = vrot.slane %v1696_v2, 1 }
 0x89a   : > { %v1703_v6 = vadd.f32 %v1702_v5, %v1701_v3  ;;  %v1708_v37 = vadd.f32 %v1707_v54, %v1706_v48  ;;  %v1698_v31 = vadd.f32 %v1697_v25, %v1696_v2  ;;  %v1585_v2 = vadd.f32 %v1584_v16, %v1583_v32 }
 0x89c   : > { %v1709_v45 = vrot.slane %v1708_v37, 2  ;;  %1740 = vperm.xlu1 %3131, %v1698_v31   ;;  %v1704_v23 = vrot.slane %v1703_v6, 1  ;;  %v1586_v5 = vrot.slane %v1585_v2, 2 }
 0x89e   : > { %v1710_v61 = vadd.f32 %v1709_v45, %v1708_v37  ;;  %v1705_v17 = vadd.f32 %v1704_v23, %v1703_v6 }
 0x8a0   : > { %1745 = vperm.xlu0 %3132, %v1705_v17   ;;  %v1711_v53 = vrot.slane %v1710_v61, 1 }
 0x8a2   : > { %v1712_v10 = vadd.f32 %v1711_v53, %v1710_v61  ;;  %v3983_v53 = vld [vmem:[%s4318_s3] sm:$0xff] }
 0x8a4   : > { %1750 = vperm.xlu1 %3131, %v1712_v10   ;;  %3133 = vset.pattern.permute.xlu0 %v3356_v40  ;;  %v3987_v10 = vrot.slane %v3983_v53, %v3584_v42 }
 0x8a5   : > { %v1529_v9 = vpop.permute.xlu0 %1528 }
 0x8a6   : > { %v1562_v14 = vmul.f32 %v3783_v7, %v1529_v9 }
 0x8a8   : > { %3134 = vset.pattern.permute.xlu1 %v3356_v40  ;;  %v1576_v60 = vsel %vm383_vm2, %v1562_v14, 0.0 }
 0x8a9   : > { %v1524_v38 = vpop.permute.xlu0 %1523  ;;  %v1577_v35 = vrot.slane %v1576_v60, 4 }
 0x8aa   : > { %v1561_v30 = vmul.f32 %v1524_v38, %v3787_v63  ;;  %v1554_v63 = vpop.permute.xlu1 %1553 }
 0x8ab   : > { %v1578_v1 = vadd.f32 %v1577_v35, %v1576_v60  ;;  %v1567_v23 = vmul.f32 %v1554_v63, %v3817_v52 }
 0x8ac   : > { %v1569_v62 = vsel %vm383_vm2, %v1561_v30, 0.0 }
 0x8ad   : > { %v1539_v34 = vpop.permute.xlu0 %1538  ;;  %v1570_v3 = vrot.slane %v1569_v62, 4  ;;  %v1579_v48 = vrot.slane %v1578_v1, 2  ;;  %v1611_v14 = vsel %vm383_vm2, %v1567_v23, 0.0 }
 0x8ae   : > { %v1564_v0 = vmul.f32 %v3791_v28, %v1539_v34  ;;  %v1587_v28 = vadd.f32 %v1586_v5, %v1585_v2  ;;  %v1612_v35 = vrot.slane %v1611_v14, 4 }
 0x8af   : > { %v1571_v25 = vadd.f32 %v1570_v3, %v1569_v62  ;;  %v1580_v31 = vadd.f32 %v1579_v48, %v1578_v1  ;;  %v3994_v1 = vrot.slane %v3983_v53, %v3596_v51 }
 0x8b0   : > { %v1590_v24 = vsel %vm383_vm2, %v1564_v0, 0.0  ;;  %v1588_v19 = vrot.slane %v1587_v28, 1  ;;  %v1613_v5 = vadd.f32 %v1612_v35, %v1611_v14 }
 0x8b1   : > { %v1544_v55 = vpop.permute.xlu0 %1543  ;;  %v1591_v6 = vrot.slane %v1590_v24, 4  ;;  %v1572_v61 = vrot.slane %v1571_v25, 2  ;;  %v1581_v39 = vrot.slane %v1580_v31, 1 }
 0x8b2   : > { %v1565_v7 = vmul.f32 %v1544_v55, %v3808_v27  ;;  %v1589_v2 = vadd.f32 %v1588_v19, %v1587_v28 }
 0x8b3   : > { %v1592_v27 = vadd.f32 %v1591_v6, %v1590_v24  ;;  %v1573_v34 = vadd.f32 %v1572_v61, %v1571_v25  ;;  %v1582_v55 = vadd.f32 %v1581_v39, %v1580_v31  ;;  %v1614_v61 = vrot.slane %v1613_v5, 2 }
 0x8b4   : > { %v1597_v54 = vsel %vm383_vm2, %v1565_v7, 0.0 }
 0x8b5   : > { %v1549_v15 = vpop.permute.xlu0 %1548  ;;  %v1598_v45 = vrot.slane %v1597_v54, 4  ;;  %v1593_v60 = vrot.slane %v1592_v27, 2  ;;  %v1574_v48 = vrot.slane %v1573_v34, 1 }
 0x8b6   : > { %v1566_v37 = vmul.f32 %v3803_v12, %v1549_v15 }
 0x8b7   : > { %v1599_v12 = vadd.f32 %v1598_v45, %v1597_v54  ;;  %v1594_v3 = vadd.f32 %v1593_v60, %v1592_v27  ;;  %v1575_v31 = vadd.f32 %v1574_v48, %v1573_v34 }
 0x8b8   : > { %v1604_v17 = vsel %vm383_vm2, %v1566_v37, 0.0 }
 0x8b9   : > { %v1559_v9 = vpop.permute.xlu0 %1558  ;;  %v1605_v52 = vrot.slane %v1604_v17, 4  ;;  %v1600_v16 = vrot.slane %v1599_v12, 2  ;;  %v1595_v23 = vrot.slane %v1594_v3, 1 }
 0x8ba   : > { %v1568_v32 = vmul.f32 %v3813_v49, %v1559_v9 }
 0x8bb   : > { %v1606_v0 = vadd.f32 %v1605_v52, %v1604_v17  ;;  %v1601_v54 = vadd.f32 %v1600_v16, %v1599_v12  ;;  %v1596_v14 = vadd.f32 %v1595_v23, %v1594_v3 }
 0x8bc   : > { %v1618_v24 = vsel %vm383_vm2, %v1568_v32, 0.0  ;;  %v1615_v32 = vadd.f32 %v1614_v61, %v1613_v5 }
 0x8bd   : > { %v1607_v63 = vrot.slane %v1606_v0, 2  ;;  %v1619_v25 = vrot.slane %v1618_v24, 4  ;;  %v1602_v17 = vrot.slane %v1601_v54, 1 }
 0x8be   : > { %v1616_v48 = vrot.slane %v1615_v32, 1 }
 0x8bf   : > { %v1608_v9 = vadd.f32 %v1607_v63, %v1606_v0  ;;  %v1603_v35 = vadd.f32 %v1602_v17, %v1601_v54 }
 0x907   : > { %v1721_v38 = vpop.permute.xlu1 %1720 }
 0x908   : > { %v1758_v30 = vmul.f32 %v3987_v10, %v1721_v38  ;;  %v1620_v38 = vadd.f32 %v1619_v25, %v1618_v24 }
 0x90a   : > { %v1766_v15 = vsub.f32 %v1582_v55, %v1758_v30  ;;  %v1621_v55 = vrot.slane %v1620_v38, 2 }
 0x90b   : > { %v1726_v62 = vpop.permute.xlu0 %1725 }
 0x90c   : > { %v1759_v7 = vmul.f32 %v3987_v10, %v1726_v62  ;;  %v1778_v37 = vsub.f32 %v1766_v15, %v3994_v1 }
 0x90e   : > { %v1767_v49 = vsub.f32 %v1589_v2, %v1759_v7  ;;  %v1793_v52 = vrot.slane %v1778_v37, 7  ;;  %v1609_v2 = vrot.slane %v1608_v9, 1 }
 0x90f   : > { %v1716_v6 = vpop.permute.xlu1 %1715 }
 0x910   : > { %v1757_v45 = vmul.f32 %v3987_v10, %v1716_v6  ;;  %v1779_v28 = vsub.f32 %v1767_v49, %v3994_v1  ;;  %v1622_v49 = vadd.f32 %v1621_v55, %v1620_v38  ;;  %v1610_v63 = vadd.f32 %v1609_v2, %v1608_v9 }
 0x912   : > { %v1765_v27 = vsub.f32 %v1575_v31, %v1757_v45  ;;  %v1795_v60 = vrot.slane %v1779_v28, 6  ;;  %v1617_v31 = vadd.f32 %v1616_v48, %v1615_v32 }
 0x913   : > { %v1731_v39 = vpop.permute.xlu1 %1730 }
 0x914   : > { %v1777_v12 = vsub.f32 %v1765_v27, %v3994_v1  ;;  %v1760_v19 = vmul.f32 %v3987_v10, %v1731_v39  ;;  %v1623_v27 = vrot.slane %v1622_v49, 1 }
 0x916   : > { %v1794_v34 = vsel %vm450_vm3, %v1793_v52, %v1777_v12  ;;  %v1768_v30 = vsub.f32 %v1596_v14, %v1760_v19  ;;  %v1624_v12 = vadd.f32 %v1623_v27, %v1622_v49 }
 0x917   : > { %v1736_v16 = vpop.permute.xlu0 %1735  ;;  %v1796_v62 = vsel %vm452_vm4, %v1795_v60, %v1794_v34 }
 0x918   : > { %v1761_v0 = vmul.f32 %v3987_v10, %v1736_v16  ;;  %v1780_v7 = vsub.f32 %v1768_v30, %v3994_v1 }
 0x91a   : > { %v1769_v24 = vsub.f32 %v1603_v35, %v1761_v0  ;;  %v1797_v15 = vrot.slane %v1780_v7, 5 }
 0x91b   : > { %v1741_v3 = vpop.permute.xlu1 %1740 }
 0x91c   : > { %v1781_v5 = vsub.f32 %v1769_v24, %v3994_v1  ;;  %v1762_v25 = vmul.f32 %v3987_v10, %v1741_v3  ;;  %v1798_v54 = vsel %vm454_vm5, %v1797_v15, %v1796_v62 }
 0x91e   : > { %v1799_v6 = vrot.slane %v1781_v5, 4  ;;  %v1770_v37 = vsub.f32 %v1610_v63, %v1762_v25 }
 0x91f   : > { %v1746_v45 = vpop.permute.xlu0 %1745 }
 0x920   : > { %v1800_v23 = vsel %vm456_vm6, %v1799_v6, %v1798_v54  ;;  %v1782_v28 = vsub.f32 %v1770_v37, %v3994_v1  ;;  %v1763_v61 = vmul.f32 %v3987_v10, %v1746_v45 }
 0x922   : > { %v1801_v17 = vrot.slane %v1782_v28, 3  ;;  %v1771_v38 = vsub.f32 %v1617_v31, %v1763_v61 }
 0x923   : > { %v1751_v39 = vpop.permute.xlu1 %1750 }
 0x924   : > { %v1802_v9 = vsel %vm458_vm7, %v1801_v17, %v1800_v23  ;;  %v1783_v52 = vsub.f32 %v1771_v38, %v3994_v1  ;;  %v1764_v14 = vmul.f32 %v3987_v10, %v1751_v39 }
 0x926   : > { %v1803_v19 = vrot.slane %v1783_v52, 2  ;;  %v1772_v60 = vsub.f32 %v1624_v12, %v1764_v14 }
 0x928   : > { %v1804_v32 = vsel %vm460_vm8, %v1803_v19, %v1802_v9  ;;  %v1784_v34 = vsub.f32 %v1772_v60, %v3994_v1 }
 0x92a   : > { %v1805_v30 = vrot.slane %v1784_v34, 1 }
 0x92c   : > { %v1806_v35 = vsel %vm462_vm9, %v1805_v30, %v1804_v32 }
 0x92d   : > { %3029 = vmatmul.mubr.msk.f32.vlgmr.msra.gmra.mrb[8].mxu0 %vm383_vm2, %v1806_v35 }
 0x92e   : > { %3032 = vmatpush3.msk.msra.mxu0 %vm242_vm0, %v3963_v22  ;;  %3033 = vmatprep.mubr.msk.f32.mxu0 %vm217_vm1, %v3929_v20 }
 0x931   : > { %3034 = vmatmul.mubr.msk.f32.vlgmr.msra.gmra.mrb[10].mxu0 %vm217_vm1, %v3919_v50 }
 0x932   : > { %3036 = vmatprep.mubr.msk.f32.mxu0 %vm217_vm1, %v3924_v59 }
 0x935   : > { %3037 = vmatmul.mubr.msk.f32.gmra.mrb[12].mxu0 %vm217_vm1, %v3934_v47 }
 0x936   : > { %3039 = vmatprep.mubr.msk.f32.mxu0 %vm217_vm1, %v3939_v18 }
 0x939   : > { %3040 = vmatmul.mubr.msk.f32.gmra.mrb[14].mxu0 %vm217_vm1, %v3944_v8 }
 0x93a   : > { %3042 = vmatprep.mubr.msk.f32.mxu0 %vm217_vm1, %v3949_v29 }
 0x93d   : > { %3043 = vmatmul.mubr.msk.f32.gmra.mrb[16].mxu0 %vm217_vm1, %v3954_v57 }
 0xa00   : > { %v1875_v22 = vpop.f32.mrb[8].mxu0 }
 0xa01   : > { %v1876_v10 = vadd.f32 %v1875_v22, %v3501_v13  ;;  %v3030_v1 = vpop.f32.mrb[9].mxu0 }
 0xa03   : > { %v1990_v16 = vcombine.high %v1876_v10, %v1876_v10  ;;  %v1997_v55 = vrot.slane %v1876_v10, %v3779_v4 }
 0xa04   : > { %v4040_v62 = vpop.f32.mrb[10].mxu0 }
 0xa05   : > { %v2004_v0 = vrot.slane %v1990_v16, %v3779_v4  ;;  %v2005_v2 = vcombine.high %v1997_v55, %v1997_v55  ;;  %v2013_v7 = vrot.slane %v1997_v55, %v3779_v4  ;;  %v4044_v24 = vpop.f32.mrb[11].mxu0 }
 0xa07   : > { %v2006_v15 = vcombine.high %v2004_v0, %v2004_v0  ;;  %v2027_v3 = vrot.slane %v2005_v2, %v3779_v4  ;;  %v2042_v48 = vrot.slane %v2013_v7, %v3581_v41  ;;  %v2035_v49 = vcombine.high %v2013_v7, %v2013_v7 }
 0xa08   : > { %v4048_v13 = vpop.f32.mrb[12].mxu0  ;;  %v2020_v5 = vrot.slane %v2004_v0, %v3779_v4 }
 0xa09   : > { %v2046_v63 = vrot.slane %v2027_v3, %v3581_v41  ;;  %v2079_v25 = vadd.f32 %v2042_v48, %v4044_v24  ;;  %v2037_v54 = vcombine.high %v2027_v3, %v2027_v3  ;;  %v4053_v6 = vpop.f32.mrb[13].mxu0  ;;  %v2050_v37 = vrot.slane %v2035_v49, %v3581_v41 }
 0xa0a   : > { %v2034_v31 = vrot.slane %v2006_v15, %v3779_v4  ;;  %v2058_v17 = vrot.slane %v2020_v5, %v3581_v41  ;;  %v2036_v39 = vcombine.high %v2020_v5, %v2020_v5 }
 0xa0b   : > { %v2080_v45 = vadd.f32 %v4040_v62, %v2046_v63  ;;  %3235 = vtanh.f32 %v2079_v25  ;;  %v2054_v23 = vrot.slane %v2037_v54, %v3581_v41  ;;  %v2081_v28 = vadd.f32 %v2050_v37, %v4053_v6 }
 0xa0c   : > { %v4060_v61 = vpop.f32.mrb[14].mxu0  ;;  %v2062_v27 = vrot.slane %v2034_v31, %v3581_v41  ;;  %v2038_v38 = vcombine.high %v2034_v31, %v2034_v31  ;;  %v2066_v60 = vrot.slane %v2036_v39, %v3581_v41 }
 0xa0d   : > { %3237 = vtanh.f32 %v2080_v45  ;;  %v2082_v9 = vadd.f32 %v4048_v13, %v2054_v23  ;;  %v4065_v52 = vpop.f32.mrb[15].mxu0 }
 0xa0e   : > { %3239 = vtanh.f32 %v2081_v28  ;;  %v2084_v4 = vadd.f32 %v4060_v61, %v2062_v27  ;;  %v2083_v12 = vadd.f32 %v2058_v17, %v4065_v52  ;;  %v2070_v14 = vrot.slane %v2038_v38, %v3581_v41 }
 0xa0f   : > { %3241 = vtanh.f32 %v2082_v9 }
 0xa10   : > { %v4070_v19 = vpop.f32.mrb[16].mxu0  ;;  %3243 = vtanh.f32 %v2083_v12 }
 0xa11   : > { %v2086_v32 = vadd.f32 %v4070_v19, %v2070_v14  ;;  %v4074_v34 = vpop.f32.mrb[17].mxu0  ;;  %3245 = vtanh.f32 %v2084_v4 }
 0xa12   : > { %v2085_v30 = vadd.f32 %v2066_v60, %v4074_v34 }
 0xa14   : > { %3247 = vtanh.f32 %v2085_v30 }
 0xa15   : > { %v3236_v35 = vpop.eup %3235  ;;  %3249 = vtanh.f32 %v2086_v32 }
 0xa16   : > { %v2095_v22 = vmul.f32 %v3236_v35, %v3530_v26 }
 0xa17   : > { %v3238_v10 = vpop.eup %3237 }
 0xa18   : > { %v3240_v1 = vpop.eup %3239  ;;  %v2103_v16 = vsel %vm383_vm2, %v2095_v22, 0.0  ;;  %v2096_v55 = vmul.f32 %v3238_v10, %v3530_v26 }
 0xa19   : > { %v3242_v0 = vpop.eup %3241  ;;  %2104 = vadd.xlane.f32.xlu0 %v2103_v16  ;;  %v2097_v2 = vmul.f32 %v3240_v1, %v3530_v26 }
 0xa1a   : > { %v2106_v7 = vsel %vm383_vm2, %v2096_v55, 0.0  ;;  %v3244_v15 = vpop.eup %3243  ;;  %v2098_v49 = vmul.f32 %v3242_v0, %v3530_v26 }
 0xa1b   : > { %2107 = vadd.xlane.f32.xlu1 %v2106_v7  ;;  %v2109_v3 = vsel %vm383_vm2, %v2097_v2, 0.0  ;;  %v2099_v48 = vmul.f32 %v3244_v15, %v3530_v26  ;;  %v3246_v5 = vpop.eup %3245 }
 0xa1c   : > { %v2112_v37 = vsel %vm383_vm2, %v2098_v49, 0.0  ;;  %v2100_v31 = vmul.f32 %v3246_v5, %v3530_v26 }
 0xa1d   : > { %2110 = vadd.xlane.f32.xlu0 %v2109_v3  ;;  %v2115_v25 = vsel %vm383_vm2, %v2099_v48, 0.0 }
 0xa1e   : > { %v3248_v63 = vpop.eup %3247  ;;  %v2118_v28 = vsel %vm383_vm2, %v2100_v31, 0.0 }
 0xa1f   : > { %2116 = vadd.xlane.f32.xlu1 %v2115_v25  ;;  %v2101_v54 = vmul.f32 %v3248_v63, %v3530_v26  ;;  %v3250_v45 = vpop.eup %3249 }
 0xa20   : > { %v2102_v27 = vmul.f32 %v3250_v45, %v3530_v26 }
 0xa21   : > { %2113 = vadd.xlane.f32.xlu0 %v2112_v37  ;;  %v2121_v23 = vsel %vm383_vm2, %v2101_v54, 0.0 }
 0xa22   : > { %v2124_v17 = vsel %vm383_vm2, %v2102_v27, 0.0 }
 0xa23   : > { %2122 = vadd.xlane.f32.xlu1 %v2121_v23 }
 0xa25   : > { %2119 = vadd.xlane.f32.xlu0 %v2118_v28 }
 0xa29   : > { %2125 = vadd.xlane.f32.xlu0 %v2124_v17 }
 0xaa6   : > { %v2105_v38 = vpop.xlane.xlu0 %2104 }
 0xaa7   : > { %v2138_v12 = vrot.slane %v2105_v38, %v3560_v58 }
 0xaa8   : > { %v2108_v39 = vpop.xlane.xlu1 %2107 }
 0xaa9   : > { %v2142_v9 = vrot.slane %v2108_v39, %v3560_v58 }
 0xaaa   : > { %v2111_v4 = vpop.xlane.xlu0 %2110 }
 0xaab   : > { %v2146_v14 = vrot.slane %v2111_v4, %v3560_v58  ;;  %v2167_v60 = vsel %vm450_vm3, %v2142_v9, %v2138_v12 }
 0xaac   : > { %v2117_v32 = vpop.xlane.xlu1 %2116 }
 0xaad   : > { %v2168_v26 = vsel %vm452_vm4, %v2146_v14, %v2167_v60  ;;  %v2154_v10 = vrot.slane %v2117_v32, %v3560_v58 }
 0xaae   : > { %v2114_v30 = vpop.xlane.xlu0 %2113 }
 0xaaf   : > { %v2150_v35 = vrot.slane %v2114_v30, %v3560_v58 }
 0xab0   : > { %v2123_v16 = vpop.xlane.xlu1 %2122 }
 0xab1   : > { %v2169_v22 = vsel %vm454_vm5, %v2150_v35, %v2168_v26  ;;  %v2162_v7 = vrot.slane %v2123_v16, %v3560_v58 }
 0xab2   : > { %v2120_v1 = vpop.xlane.xlu0 %2119  ;;  %v2170_v0 = vsel %vm456_vm6, %v2154_v10, %v2169_v22 }
 0xab3   : > { %v2158_v55 = vrot.slane %v2120_v1, %v3560_v58 }
 0xab5   : > { %v2171_v2 = vsel %vm458_vm7, %v2158_v55, %v2170_v0 }
 0xab6   : > { %v2126_v15 = vpop.xlane.xlu0 %2125  ;;  %v2172_v48 = vsel %vm460_vm8, %v2162_v7, %v2171_v2 }
 0xab7   : > { %v2166_v3 = vrot.slane %v2126_v15, %v3560_v58 }
 0xab9   : > { %v2173_v49 = vsel %vm462_vm9, %v2166_v3, %v2172_v48 }
 0xaba   : > { %v2175_v5 = vsel %vm465_vm10, %v2173_v49, -inf }
 0xabb   : > { %2176 = vmax.xlane.f32.xlu1 %v2175_v5 }
 0xb48   : > { %v2177_v63 = vpop.xlane.xlu1 %2176 }
 0xb49   : > { %v2182_v25 = vrot.slane %v2177_v63, %v3581_v41  ;;  %v2186_v54 = vrot.slane %v2177_v63, %v3584_v42  ;;  %v2190_v37 = vrot.slane %v2177_v63, %v3587_v43  ;;  %v2194_v23 = vrot.slane %v2177_v63, %v3590_v44 }
 0xb4a   : > { %v2198_v9 = vrot.slane %v2177_v63, %v3596_v51  ;;  %v2202_v60 = vrot.slane %v2177_v63, %v3600_v56  ;;  %v2206_v22 = vrot.slane %v2177_v63, %v3492_v11 }
 0xb4b   : > { %v2219_v31 = vsub.f32 %v2105_v38, %v2182_v25  ;;  %v2220_v45 = vsub.f32 %v2108_v39, %v2186_v54  ;;  %v2221_v28 = vsub.f32 %v2111_v4, %v2190_v37  ;;  %v2222_v12 = vsub.f32 %v2114_v30, %v2194_v23 }
 0xb4c   : > { %v2223_v35 = vsub.f32 %v2117_v32, %v2198_v9  ;;  %v2224_v38 = vsub.f32 %v2120_v1, %v2202_v60  ;;  %v2210_v30 = vrot.slane %v2177_v63, %v3518_v21  ;;  %v2225_v55 = vsub.f32 %v2123_v16, %v2206_v22 }
 0xb4d   : > { %v2227_v27 = vmul.f32 1.442695, %v2219_v31  ;;  %v2229_v17 = vmul.f32 1.442695, %v2220_v45  ;;  %v2231_v14 = vmul.f32 1.442695, %v2221_v28 }
 0xb4e   : > { %v2233_v26 = vmul.f32 1.442695, %v2222_v12  ;;  %v2235_v39 = vmul.f32 1.442695, %v2223_v35  ;;  %v2237_v32 = vmul.f32 1.442695, %v2224_v38  ;;  %v2226_v2 = vsub.f32 %v2126_v15, %v2210_v30 }
 0xb4f   : > { %3251 = vpow2.f32 %v2227_v27  ;;  %v2239_v1 = vmul.f32 1.442695, %v2225_v55 }
 0xb50   : > { %3253 = vpow2.f32 %v2229_v17  ;;  %v2241_v3 = vmul.f32 1.442695, %v2226_v2 }
 0xb51   : > { %3255 = vpow2.f32 %v2231_v14 }
 0xb52   : > { %3257 = vpow2.f32 %v2233_v26 }
 0xb53   : > { %3259 = vpow2.f32 %v2235_v39 }
 0xb54   : > { %3261 = vpow2.f32 %v2237_v32 }
 0xb55   : > { %3263 = vpow2.f32 %v2239_v1 }
 0xb56   : > { %3265 = vpow2.f32 %v2241_v3 }
 0xb59   : > { %v4116_v10 = vpop.eup %3251 }
 0xb5a   : > { %v4118_v4 = vpop.eup %3253  ;;  %2252 = vperm.xlu0 %3133, %v4116_v10  }
 0xb5b   : > { %2255 = vperm.xlu1 %3134, %v4118_v4   ;;  %v3256_v0 = vpop.eup %3255 }
 0xb5c   : > { %v4123_v7 = vpop.eup %3257 }
 0xb5d   : > { %v4126_v48 = vpop.eup %3259 }
 0xb5e   : > { %v4129_v49 = vpop.eup %3261 }
 0xb5f   : > { %2258 = vperm.xlu1 %3134, %v3256_v0   ;;  %v4132_v16 = vpop.eup %3263 }
 0xb60   : > { %v3266_v15 = vpop.eup %3265 }
 0xb63   : > { %2261 = vperm.xlu1 %3134, %v4123_v7  }
 0xb67   : > { %2264 = vperm.xlu1 %3134, %v4126_v48  }
 0xb6b   : > { %2267 = vperm.xlu1 %3134, %v4129_v49  }
 0xb6f   : > { %2270 = vperm.xlu1 %3134, %v4132_v16  }
 0xb73   : > { %2273 = vperm.xlu1 %3134, %v3266_v15  }
 0xbd9   : > { %v2253_v37 = vpop.permute.xlu0 %2252 }
 0xbda   : > { %v2256_v5 = vpop.permute.xlu1 %2255  ;;  %v2278_v23 = vrot.slane %v2253_v37, %v3560_v58 }
 0xbdb   : > { %v2282_v45 = vrot.slane %v2256_v5, %v3560_v58 }
 0xbdd   : > { %v2307_v12 = vsel %vm450_vm3, %v2282_v45, %v2278_v23 }
 0xbde   : > { %v2259_v63 = vpop.permute.xlu1 %2258 }
 0xbdf   : > { %v2286_v28 = vrot.slane %v2259_v63, %v3560_v58 }
 0xbe1   : > { %v2308_v60 = vsel %vm452_vm4, %v2286_v28, %v2307_v12 }
 0xbe2   : > { %v2262_v25 = vpop.permute.xlu1 %2261 }
 0xbe3   : > { %v2290_v27 = vrot.slane %v2262_v25, %v3560_v58 }
 0xbe5   : > { %v2309_v26 = vsel %vm454_vm5, %v2290_v27, %v2308_v60 }
 0xbe6   : > { %v2265_v54 = vpop.permute.xlu1 %2264 }
 0xbe7   : > { %v2294_v17 = vrot.slane %v2265_v54, %v3560_v58 }
 0xbe9   : > { %v2310_v22 = vsel %vm456_vm6, %v2294_v17, %v2309_v26 }
 0xbea   : > { %v2268_v31 = vpop.permute.xlu1 %2267 }
 0xbeb   : > { %v2298_v14 = vrot.slane %v2268_v31, %v3560_v58 }
 0xbed   : > { %v2311_v39 = vsel %vm458_vm7, %v2298_v14, %v2310_v22 }
 0xbee   : > { %v2271_v9 = vpop.permute.xlu1 %2270 }
 0xbef   : > { %v2302_v35 = vrot.slane %v2271_v9, %v3560_v58 }
 0xbf1   : > { %v2312_v55 = vsel %vm460_vm8, %v2302_v35, %v2311_v39 }
 0xbf2   : > { %v2274_v38 = vpop.permute.xlu1 %2273 }
 0xbf3   : > { %v2306_v30 = vrot.slane %v2274_v38, %v3560_v58 }
 0xbf5   : > { %v2313_v32 = vsel %vm462_vm9, %v2306_v30, %v2312_v55 }
 0xbf6   : > { %v2315_v2 = vsel %vm465_vm10, %v2313_v32, 0.0 }
 0xbf7   : > { %2316 = vadd.xlane.f32.xlu1 %v2315_v2 }
 0xc84   : > { %v2317_v1 = vpop.xlane.xlu1 %2316 }
 0xc85   : > { %v2330_v3 = vrot.slane %v2317_v1, %v3587_v43  ;;  %v2326_v5 = vrot.slane %v2317_v1, %v3584_v42  ;;  %v2350_v63 = vrot.slane %v2317_v1, %v3518_v21  ;;  %v2322_v25 = vrot.slane %v2317_v1, %v3581_v41 }
 0xc86   : > { %v2334_v58 = vrot.slane %v2317_v1, %v3590_v44  ;;  %v2338_v45 = vrot.slane %v2317_v1, %v3596_v51  ;;  %v2342_v42 = vrot.slane %v2317_v1, %v3600_v56  ;;  %v2346_v44 = vrot.slane %v2317_v1, %v3492_v11 }
 0xc87   : > { %3267 = vrcp.f32 %v2330_v3 }
 0xc88   : > { %3269 = vrcp.f32 %v2326_v5 }
 0xc89   : > { %3271 = vrcp.f32 %v2350_v63 }
 0xc8a   : > { %3273 = vrcp.f32 %v2322_v25 }
 0xc8b   : > { %3275 = vrcp.f32 %v2334_v58 }
 0xc8c   : > { %3277 = vrcp.f32 %v2338_v45 }
 0xc8d   : > { %3279 = vrcp.f32 %v2342_v42 }
 0xc8e   : > { %3281 = vrcp.f32 %v2346_v44 }
 0xc91   : > { %v3268_v54 = vpop.eup %3267 }
 0xc92   : > { %v3270_v37 = vpop.eup %3269  ;;  %v2364_v31 = vmul.f32 %v3268_v54, %v3256_v0 }
 0xc93   : > { %v3272_v23 = vpop.eup %3271  ;;  %v2362_v28 = vmul.f32 %v3270_v37, %v4118_v4 }
 0xc94   : > { %2387 = vperm.xlu1 %3134, %v2364_v31   ;;  %v2374_v21 = vmul.f32 %v3272_v23, %v3266_v15  ;;  %v3274_v27 = vpop.eup %3273 }
 0xc95   : > { %2481 = vrot.lane.b32.xlu0 %v2362_v28, %s3357_s10  ;;  %v2360_v0 = vmul.f32 %v3274_v27, %v4116_v10  ;;  %v3276_v51 = vpop.eup %3275 }
 0xc96   : > { %v2366_v4 = vmul.f32 %v3276_v51, %v4123_v7  ;;  %v3278_v15 = vpop.eup %3277 }
 0xc97   : > { %v2368_v17 = vmul.f32 %v3278_v15, %v4126_v48  ;;  %v3280_v9 = vpop.eup %3279 }
 0xc98   : > { %2412 = vperm.xlu1 %3134, %v2374_v21   ;;  %v2370_v11 = vmul.f32 %v3280_v9, %v4129_v49  ;;  %v3282_v12 = vpop.eup %3281 }
 0xc99   : > { %2483 = vrot.lane.b32.xlu0 %v2364_v31, %s3357_s10  ;;  %v2372_v10 = vmul.f32 %v3282_v12, %v4132_v16 }
 0xc9c   : > { %3136 = vset.pattern.permute.xlu1 %v3358_v33 }
 0xc9d   : > { %2479 = vrot.lane.b32.xlu0 %v2360_v0, %s3357_s10 }
 0xca1   : > { %2485 = vrot.lane.b32.xlu0 %v2366_v4, %s3357_s10 }
 0xca5   : > { %2487 = vrot.lane.b32.xlu0 %v2368_v17, %s3357_s10 }
 0xca9   : > { %2489 = vrot.lane.b32.xlu0 %v2370_v11, %s3357_s10 }
 0xcad   : > { %2491 = vrot.lane.b32.xlu0 %v2372_v10, %s3357_s10 }
 0xcb1   : > { %2493 = vrot.lane.b32.xlu0 %v2374_v21, %s3357_s10  ;;  %s3296_s10 = sshll.u32 %s3363_s19, 4  ;;  %s3297_s10 = int_to_ptr.vmem [resolvable:$false] %s3296_s10 }
 0xcb2   : > { %s3298_s11 = scalar_lea.vmem %s3297_s10, 32  ;;  %p3299_p0 = scmp.lt.s32.totalorder %s4275_s30, %s3297_s10 }
 0xcb3   : > { %p3300_p1 = scmp.lt.s32.totalorder %s3298_s11, %s3292_s9 }
 0xcb5   : > { %2382 = vperm.xlu0 %3133, %v2362_v28   ;;  %p3301_p2 = por %p3300_p1, %p3299_p0 }
 0xcb7   : > { %p3302_p3 = pnand %p3301_p2, %p3295_p13 }
 0xcb9   : > { %2377 = vperm.xlu0 %3133, %v2360_v0  }
 0xcbd   : > { %2392 = vperm.xlu0 %3133, %v2366_v4  }
 0xcc1   : > { %2397 = vperm.xlu0 %3133, %v2368_v17  }
 0xcc5   : > { %2402 = vperm.xlu0 %3133, %v2370_v11  }
 0xcc9   : > { %2407 = vperm.xlu0 %3133, %v2372_v10  }
 0xccd   : > { %3135 = vset.pattern.permute.xlu0 %v3358_v33 }
 0xd07   : > { %v2482_v7 = vpop.permute.xlu0 %2481 }
 0xd08   : > { %v2504_v48 = vmul.f32 %v3919_v50, %v2482_v7 }
 0xd0a   : > { %v2518_v49 = vsel %vm802_vm11, %v2504_v48, 0.0 }
 0xd0b   : > { %v2519_v14 = vrot.slane %v2518_v49, 4  ;;  %v2484_v60 = vpop.permute.xlu0 %2483 }
 0xd0c   : > { %v2505_v16 = vmul.f32 %v3924_v59, %v2484_v60 }
 0xd0d   : > { %v2520_v35 = vadd.f32 %v2519_v14, %v2518_v49 }
 0xd0e   : > { %v2525_v26 = vsel %vm802_vm11, %v2505_v16, 0.0 }
 0xd0f   : > { %v2521_v22 = vrot.slane %v2520_v35, 2  ;;  %v2526_v38 = vrot.slane %v2525_v26, 4  ;;  %v2480_v39 = vpop.permute.xlu0 %2479 }
 0xd10   : > { %v2503_v30 = vmul.f32 %v3929_v20, %v2480_v39 }
 0xd11   : > { %v2522_v55 = vadd.f32 %v2521_v22, %v2520_v35  ;;  %v2527_v32 = vadd.f32 %v2526_v38, %v2525_v26 }
 0xd12   : > { %v2511_v33 = vsel %vm802_vm11, %v2503_v30, 0.0 }
 0xd13   : > { %v2523_v2 = vrot.slane %v2522_v55, 1  ;;  %v2528_v50 = vrot.slane %v2527_v32, 2  ;;  %v2512_v1 = vrot.slane %v2511_v33, 4  ;;  %v2486_v3 = vpop.permute.xlu0 %2485 }
 0xd14   : > { %v2506_v5 = vmul.f32 %v3934_v47, %v2486_v3 }
 0xd15   : > { %v2529_v63 = vadd.f32 %v2528_v50, %v2527_v32  ;;  %v2513_v59 = vadd.f32 %v2512_v1, %v2511_v33  ;;  %v2524_v25 = vadd.f32 %v2523_v2, %v2522_v55 }
 0xd16   : > { %v2532_v58 = vsel %vm802_vm11, %v2506_v5, 0.0 }
 0xd17   : > { %v2530_v54 = vrot.slane %v2529_v63, 1  ;;  %v2514_v37 = vrot.slane %v2513_v59, 2  ;;  %v2533_v31 = vrot.slane %v2532_v58, 4  ;;  %2574 = vperm.xlu0 %3135, %v2524_v25   ;;  %v2488_v20 = vpop.permute.xlu0 %2487 }
 0xd18   : > { %v2507_v45 = vmul.f32 %v3939_v18, %v2488_v20  ;;  %v2899_v20 = vld [vmem:[%s4317_s2 + $0x38] sm:$0xff] }
 0xd19   : > { %v2515_v23 = vadd.f32 %v2514_v37, %v2513_v59  ;;  %v2534_v28 = vadd.f32 %v2533_v31, %v2532_v58  ;;  %v2531_v21 = vadd.f32 %v2530_v54, %v2529_v63  ;;  %v2896_v58 = vld [vmem:[%s4317_s2 + $0x20] sm:$0xff]  ;;  %v2897_v54 = vld [vmem:[%s4317_s2 + $0x28] sm:$0xff]  ;;  %v2898_v31 = vld [vmem:[%s4317_s2 + $0x30] sm:$0xff] }
 0xd1a   : > { %v2539_v42 = vsel %vm802_vm11, %v2507_v45, 0.0  ;;  %v3074_v37 = vpack.c.bf16 %v2897_v54, %v2896_v58  ;;  %v3077_v45 = vpack.c.bf16 %v2899_v20, %v2898_v31 }
 0xd1b   : > { %v2516_v27 = vrot.slane %v2515_v23, 1  ;;  %v2535_v44 = vrot.slane %v2534_v28, 2  ;;  %v2540_v47 = vrot.slane %v2539_v42, 4  ;;  %2579 = vperm.xlu1 %3136, %v2531_v21   ;;  %v2490_v0 = vpop.permute.xlu0 %2489 }
 0xd1c   : > { %v2508_v51 = vmul.f32 %v3944_v8, %v2490_v0  ;;  %3075 = vmatpush3.bf16.msra.mxu1 %v3074_v37 }
 0xd1d   : > { %v2536_v4 = vadd.f32 %v2535_v44, %v2534_v28  ;;  %v2541_v15 = vadd.f32 %v2540_v47, %v2539_v42  ;;  %v2517_v17 = vadd.f32 %v2516_v27, %v2515_v23  ;;  %3076 = vmatprep.subr.bf16.mxu1 %v3359_v36  ;;  %v4209_v23 = vld [vmem:[%s4318_s3 + $0x8] sm:$0x7]  ;;  %v2388_v28 = vpop.permute.xlu1 %2387 }
 0xd1e   : > { %v2546_v9 = vsel %vm802_vm11, %v2508_v51, 0.0  ;;  %v2417_v42 = vmul.f32 %v2388_v28, %v4053_v6 }
 0xd1f   : > { %v2537_v11 = vrot.slane %v2536_v4, 1  ;;  %v2542_v12 = vrot.slane %v2541_v15, 2  ;;  %v2547_v18 = vrot.slane %v2546_v9, 4  ;;  %2569 = vperm.xlu1 %3136, %v2517_v17   ;;  %v2492_v10 = vpop.permute.xlu0 %2491 }
 0xd20   : > { %v2509_v7 = vmul.f32 %v3949_v29, %v2492_v10  ;;  %3078 = vmatpush3.bf16.msra.mxu1 %v3077_v45  ;;  %v2437_v47 = vsel %vm383_vm2, %v2417_v42, 0.0 }
 0xd21   : > { %v2543_v48 = vadd.f32 %v2542_v12, %v2541_v15  ;;  %v2548_v49 = vadd.f32 %v2547_v18, %v2546_v9  ;;  %v2538_v14 = vadd.f32 %v2537_v11, %v2536_v4  ;;  %3056 = vmatprep.subr.mxu1 %v3361_v46  ;;  %v2438_v15 = vrot.slane %v2437_v47, 4 }
 0xd22   : > { %v2553_v60 = vsel %vm802_vm11, %v2509_v7, 0.0 }
 0xd23   : > { %v2544_v16 = vrot.slane %v2543_v48, 1  ;;  %v2549_v35 = vrot.slane %v2548_v49, 2  ;;  %v2554_v8 = vrot.slane %v2553_v60, 4  ;;  %2584 = vperm.xlu0 %3135, %v2538_v14   ;;  %v2494_v26 = vpop.permute.xlu0 %2493  ;;  %v2439_v12 = vadd.f32 %v2438_v15, %v2437_v47 }
 0xd24   : > { %v2510_v22 = vmul.f32 %v3954_v57, %v2494_v26 }
 0xd25   : > { %v2550_v38 = vadd.f32 %v2549_v35, %v2548_v49  ;;  %v2555_v39 = vadd.f32 %v2554_v8, %v2553_v60  ;;  %v2545_v30 = vadd.f32 %v2544_v16, %v2543_v48  ;;  %v2440_v48 = vrot.slane %v2439_v12, 2  ;;  %v2413_v8 = vpop.permute.xlu1 %2412 }
 0xd26   : > { %v2560_v55 = vsel %vm802_vm11, %v2510_v22, 0.0 }
 0xd27   : > { %v2551_v32 = vrot.slane %v2550_v38, 1  ;;  %v2556_v33 = vrot.slane %v2555_v39, 2  ;;  %v2561_v29 = vrot.slane %v2560_v55, 4  ;;  %2589 = vperm.xlu1 %3136, %v2545_v30   ;;  %v2441_v35 = vadd.f32 %v2440_v48, %v2439_v12 }
 0xd29   : > { %v2557_v2 = vadd.f32 %v2556_v33, %v2555_v39  ;;  %v2562_v50 = vadd.f32 %v2561_v29, %v2560_v55  ;;  %v2552_v1 = vadd.f32 %v2551_v32, %v2550_v38  ;;  %v2422_v55 = vmul.f32 %v4070_v19, %v2413_v8 }
 0xd2b   : > { %v2558_v3 = vrot.slane %v2557_v2, 1  ;;  %v2563_v5 = vrot.slane %v2562_v50, 2  ;;  %2594 = vperm.xlu0 %3135, %v2552_v1  }
 0xd2d   : > { %v2564_v63 = vadd.f32 %v2563_v5, %v2562_v50  ;;  %v2559_v59 = vadd.f32 %v2558_v3, %v2557_v2  ;;  %v2442_v50 = vrot.slane %v2441_v35, 1 }
 0xd2f   : > { %v2565_v25 = vrot.slane %v2564_v63, 1  ;;  %2599 = vperm.xlu1 %3136, %v2559_v59  }
 0xd31   : > { %v2566_v57 = vadd.f32 %v2565_v25, %v2564_v63  ;;  %v2472_v63 = vsel %vm383_vm2, %v2422_v55, 0.0 }
 0xd33   : > { %2604 = vperm.xlu0 %3135, %v2566_v57   ;;  %3137 = vset.pattern.permute.xlu1 %v3356_v40  ;;  %v2443_v57 = vadd.f32 %v2442_v50, %v2441_v35 }
 0xd34   : > { %2740 = vperm.xlu1 %3137, %v4209_v23  }
 0xd37   : > { %3138 = vset.pattern.permute.xlu0 %v3356_v40  ;;  %v2383_v40 = vpop.permute.xlu0 %2382 }
 0xd38   : > { %v2416_v21 = vmul.f32 %v4040_v62, %v2383_v40  ;;  %v2473_v40 = vrot.slane %v2472_v63, 4 }
 0xd3a   : > { %v2430_v44 = vsel %vm383_vm2, %v2416_v21, 0.0 }
 0xd3b   : > { %v2378_v36 = vpop.permute.xlu0 %2377  ;;  %v2431_v51 = vrot.slane %v2430_v44, 4 }
 0xd3c   : > { %v2415_v0 = vmul.f32 %v2378_v36, %v4044_v24 }
 0xd3d   : > { %v2432_v11 = vadd.f32 %v2431_v51, %v2430_v44  ;;  %v2474_v51 = vadd.f32 %v2473_v40, %v2472_v63 }
 0xd3e   : > { %v2423_v9 = vsel %vm383_vm2, %v2415_v0, 0.0 }
 0xd3f   : > { %v2393_v27 = vpop.permute.xlu0 %2392  ;;  %v2424_v18 = vrot.slane %v2423_v9, 4  ;;  %v2433_v7 = vrot.slane %v2432_v11, 2  ;;  %v2475_v48 = vrot.slane %v2474_v51, 2 }
 0xd40   : > { %v2418_v17 = vmul.f32 %v4048_v13, %v2393_v27 }
 0xd41   : > { %v2425_v14 = vadd.f32 %v2424_v18, %v2423_v9  ;;  %v2434_v16 = vadd.f32 %v2433_v7, %v2432_v11 }
 0xd42   : > { %v2444_v62 = vsel %vm383_vm2, %v2418_v17, 0.0 }
 0xd43   : > { %v2398_v4 = vpop.permute.xlu0 %2397  ;;  %v2445_v49 = vrot.slane %v2444_v62, 4  ;;  %v2426_v38 = vrot.slane %v2425_v14, 2  ;;  %v2435_v32 = vrot.slane %v2434_v16, 1 }
 0xd44   : > { %v2419_v6 = vmul.f32 %v2398_v4, %v4065_v52  ;;  %v4227_v52 = vrot.slane %v3983_v53, %v3587_v43  ;;  %v4236_v43 = vrot.slane %v3983_v53, %v3600_v56 }
 0xd45   : > { %v2446_v26 = vadd.f32 %v2445_v49, %v2444_v62  ;;  %v2427_v1 = vadd.f32 %v2426_v38, %v2425_v14  ;;  %v2436_v59 = vadd.f32 %v2435_v32, %v2434_v16 }
 0xd46   : > { %v2451_v24 = vsel %vm383_vm2, %v2419_v6, 0.0 }
 0xd47   : > { %v2403_v10 = vpop.permute.xlu0 %2402  ;;  %v2452_v22 = vrot.slane %v2451_v24, 4  ;;  %v2447_v33 = vrot.slane %v2446_v26, 2  ;;  %v2428_v20 = vrot.slane %v2427_v1, 1 }
 0xd48   : > { %v2420_v60 = vmul.f32 %v4060_v61, %v2403_v10 }
 0xd49   : > { %v2453_v61 = vadd.f32 %v2452_v22, %v2451_v24  ;;  %v2429_v53 = vadd.f32 %v2428_v20, %v2427_v1  ;;  %v2476_v22 = vadd.f32 %v2475_v48, %v2474_v51 }
 0xd4a   : > { %v2458_v39 = vsel %vm383_vm2, %v2420_v60, 0.0 }
 0xd4b   : > { %v2408_v13 = vpop.permute.xlu0 %2407  ;;  %v2459_v29 = vrot.slane %v2458_v39, 4  ;;  %v2454_v19 = vrot.slane %v2453_v61, 2  ;;  %v2477_v50 = vrot.slane %v2476_v22, 1 }
 0xd4c   : > { %v2421_v30 = vmul.f32 %v2408_v13, %v4074_v34  ;;  %v2448_v34 = vadd.f32 %v2447_v33, %v2446_v26 }
 0xd4d   : > { %v2460_v25 = vadd.f32 %v2459_v29, %v2458_v39  ;;  %v2455_v36 = vadd.f32 %v2454_v19, %v2453_v61 }
 0xd4e   : > { %v2465_v5 = vsel %vm383_vm2, %v2421_v30, 0.0  ;;  %v2449_v42 = vrot.slane %v2448_v34, 1 }
 0xd4f   : > { %v2466_v54 = vrot.slane %v2465_v5, 4  ;;  %v2461_v28 = vrot.slane %v2460_v25, 2  ;;  %v2456_v9 = vrot.slane %v2455_v36, 1 }
 0xd50   : > { %v2450_v15 = vadd.f32 %v2449_v42, %v2448_v34 }
 0xd51   : > { %v2467_v27 = vadd.f32 %v2466_v54, %v2465_v5  ;;  %v2462_v4 = vadd.f32 %v2461_v28, %v2460_v25  ;;  %v2457_v13 = vadd.f32 %v2456_v9, %v2455_v36  ;;  %v2642_v28 = vrot.slane %v4209_v23, %v3581_v41 }
 0xd53   : > { %v2468_v11 = vrot.slane %v2467_v27, 2  ;;  %v2463_v24 = vrot.slane %v2462_v4, 1 }
 0xd55   : > { %v2469_v60 = vadd.f32 %v2468_v11, %v2467_v27  ;;  %v2464_v38 = vadd.f32 %v2463_v24, %v2462_v4 }
 0xd57   : > { %v2470_v33 = vrot.slane %v2469_v60, 1 }
 0xd59   : > { %v2471_v5 = vadd.f32 %v2470_v33, %v2469_v60 }
 0xd96   : > { %v2575_v2 = vpop.permute.xlu0 %2574 }
 0xd97   : > { %v2612_v3 = vmul.f32 %v4227_v52, %v2575_v2 }
 0xd99   : > { %v2620_v37 = vsub.f32 %v2436_v59, %v2612_v3 }
 0xd9a   : > { %v2580_v58 = vpop.permute.xlu1 %2579 }
 0xd9b   : > { %v2613_v31 = vmul.f32 %v4227_v52, %v2580_v58  ;;  %v2632_v56 = vsub.f32 %v2620_v37, %v4236_v43  ;;  %v2478_v58 = vadd.f32 %v2477_v50, %v2476_v22 }
 0xd9d   : > { %v2621_v45 = vsub.f32 %v2443_v57, %v2613_v31  ;;  %v2651_v12 = vrot.slane %v2632_v56, 7  ;;  %v2742_v56 = vrot.slane %v4209_v23, 1 }
 0xd9e   : > { %v2570_v21 = vpop.permute.xlu1 %2569 }
 0xd9f   : > { %v2611_v44 = vmul.f32 %v4227_v52, %v2570_v21  ;;  %v2633_v47 = vsub.f32 %v2621_v45, %v4236_v43 }
 0xda1   : > { %v2619_v0 = vsub.f32 %v2429_v53, %v2611_v44  ;;  %v2653_v6 = vrot.slane %v2633_v47, 6 }
 0xda2   : > { %v2585_v17 = vpop.permute.xlu0 %2584 }
 0xda3   : > { %v2631_v18 = vsub.f32 %v2619_v0, %v4236_v43  ;;  %v2614_v62 = vmul.f32 %v4227_v52, %v2585_v17 }
 0xda5   : > { %v2652_v10 = vsel %vm450_vm3, %v2651_v12, %v2631_v18  ;;  %v2622_v7 = vsub.f32 %v2450_v15, %v2614_v62 }
 0xda6   : > { %v2654_v49 = vsel %vm452_vm4, %v2653_v6, %v2652_v10  ;;  %v2590_v14 = vpop.permute.xlu1 %2589 }
 0xda7   : > { %v2634_v16 = vsub.f32 %v2622_v7, %v4236_v43  ;;  %v2615_v35 = vmul.f32 %v4227_v52, %v2590_v14 }
 0xda9   : > { %v2655_v8 = vrot.slane %v2634_v16, 5  ;;  %v2623_v26 = vsub.f32 %v2457_v13, %v2615_v35 }
 0xdaa   : > { %v2595_v39 = vpop.permute.xlu0 %2594 }
 0xdab   : > { %v2656_v30 = vsel %vm454_vm5, %v2655_v8, %v2654_v49  ;;  %v2635_v55 = vsub.f32 %v2623_v26, %v4236_v43  ;;  %v2616_v32 = vmul.f32 %v4227_v52, %v2595_v39 }
 0xdad   : > { %v2657_v61 = vrot.slane %v2635_v55, 4  ;;  %v2624_v29 = vsub.f32 %v2464_v38, %v2616_v32 }
 0xdae   : > { %v2600_v2 = vpop.permute.xlu1 %2599 }
 0xdaf   : > { %v2658_v1 = vsel %vm456_vm6, %v2657_v61, %v2656_v30  ;;  %v2636_v3 = vsub.f32 %v2624_v29, %v4236_v43  ;;  %v2617_v63 = vmul.f32 %v4227_v52, %v2600_v2 }
 0xdb1   : > { %v2659_v59 = vrot.slane %v2636_v3, 3  ;;  %v2625_v34 = vsub.f32 %v2471_v5, %v2617_v63 }
 0xdb2   : > { %v2605_v19 = vpop.permute.xlu0 %2604 }
 0xdb3   : > { %v2660_v25 = vsel %vm458_vm7, %v2659_v59, %v2658_v1  ;;  %v2637_v57 = vsub.f32 %v2625_v34, %v4236_v43  ;;  %v2618_v54 = vmul.f32 %v4227_v52, %v2605_v19 }
 0xdb5   : > { %v2661_v37 = vrot.slane %v2637_v57, 2  ;;  %v2626_v31 = vsub.f32 %v2478_v58, %v2618_v54 }
 0xdb7   : > { %v2662_v20 = vsel %vm460_vm8, %v2661_v37, %v2660_v25  ;;  %v2638_v45 = vsub.f32 %v2626_v31, %v4236_v43  ;;  %v2741_v43 = vpop.permute.xlu1 %2740 }
 0xdb8   : > { %v2743_v53 = vrot.slane %v2741_v43, 2 }
 0xdb9   : > { %v2663_v40 = vrot.slane %v2638_v45, 1 }
 0xdbb   : > { %v2664_v36 = vsel %vm462_vm9, %v2663_v40, %v2662_v20 }
 0xdbc   : > { %3054 = vmatmul.mubr.msk.f32.vlgmr.msra.gmra.mrb[10].mxu1 %vm383_vm2, %v2664_v36 }
 0xdbd   : > { %3058 = vmatprep.mubr.msk.f32.mxu1 %vm3360_vm12, %v3361_v46 }
 0xe8f   : > { %v2733_v52 = vpop.f32.mrb[10].mxu1 }
 0xe90   : > { %v2734_v21 = vadd.f32 %v2733_v52, %v2642_v28  ;;  %v3055_v42 = vpop.f32.mrb[11].mxu1 }
 0xe92   : > { %v2737_v27 = vmax.f32 %v2734_v21, 0.0 }
 0xe94   : > { %3057 = vmatpush3.xpose.msk.msra.mxu1 %vm383_vm2, %v2737_v27 }
 0xe97   : > { %3059 = vmatmul.mubr.msk.f32.vlgmr.msra.gmra.mrb[12].mxu1 %vm383_vm2, %v2742_v56 }
 0xf6a   : > { %v2816_v46 = vpop.f32.mrb[12].mxu1 }
 0xf6b   : > { %v2817_v41 = vadd.f32 %v2816_v46, %v2743_v53  ;;  %v3060_v44 = vpop.f32.mrb[13].mxu1 }
 0xf6d   : > { %2821 = vst.msk [vmem:[%s190_s29] sm:$0x1] %vm2820_vm13, %v2817_v41 }
 0xf6e   : > { %3305 = shalt.err (!%p3302_p3)
}
 0xf6f   : > { %s3306_s12 = scalar_lea.hbm %s4273_s7, 16  ;;  %s3310_s20 = scalar_lea.hbm %s4319_s4, 32 }
 0xf70   : > { %p3307_p4 = scmp.ne.s32.totalorder %s4273_s7, %s3306_s12  ;;  %p3311_p9 = scmp.lt.u32.totalorder %s4273_s7, %s4319_s4 }
 0xf71   : > { %p3312_p10 = scmp.lt.u32.totalorder %s3310_s20, %s3306_s12  ;;  %p3314_p12 = scmp.lt.u32.totalorder %s3306_s12, %s4273_s7 }
 0xf72   : > { %p3308_p7 = pnand %p3307_p4, %p3427_p5 }
 0xf73   : > { %p3313_p11 = por %p3312_p10, %p3311_p9 }
 0xf74   : > { %p3309_p8 = pneg %p3308_p7 }
 0xf75   : > { %p3315_p13 = por %p3314_p12, %p3313_p11 }
 0xf77   : > { %p3316_p0 = pnand %p3315_p13, %p3309_p8 }
 0xf79   : > { %3319 = shalt.err (!%p3316_p0)
}
 0xf7a   : > { %3079 = dma.vmem_to_hbm [thread:$0]  (%p3427_p5), %s4275_s30, 16, %s4273_s7, %s2823_s8  }
 0xf7b PF: > { %p3085_p1 = scmp.ge.s32.totalorder %s3354_s18, 2  ;;  %s2847_s27 = sand.u32 1, %s3342_s15  }
 0xf7c   : > { %s2848_s28 = scalar_lea.sflag [#allocation3], %s2847_s27 }
 0xf7d   : > { %p3082_p2 = pnand %p3085_p1, %p3431_p6 }
 0xf7f   : > { %3337 = dma.done.wait (!%p3082_p2), %s2848_s28, 16  }
 0xf80   : > { %3339 = vsyncadd (!%p3082_p2), %s2848_s28, 4294967280  ;;  %p14_p3 = scmp.ge.s32.totalorder %s3414_s21, 4   ;;  %s4322_s15 = smov %s3346_s16 }
 0xf81   : > { %s4323_s16 = smov %s3350_s17  ;;  %s4324_s17 = smov %s3425_s24 }
 0xf82   : > { %s4325_s18 = smov %s3414_s21  ;;  %16 = sbr.rel (!%p14_p3) target bundleno = 3 (0x3), region = 74 }
 0xf89   :  { %2852 = vsyncpa [#allocation3], 1 }
 0xf8a   :  { %2854 = vsyncpa [#allocation3 + $0x1], 1 }

</bundles_post_ra>
